<compile_context>
chip_gen: v5e
topology: v5e:2x2
jax: 0.10.0
libtpu: 0.0.40
codegen_flags: <defaults>
</compile_context>

<pallas_src>
import functools

import jax
import jax.numpy as jnp
from jax.experimental import pallas as pl
from jax.experimental.pallas import tpu as pltpu


def add_layernorm_kernel(a_ref, b_ref, gamma_ref, beta_ref, o_ref, *, eps, inv_c):
    # a_ref, b_ref, o_ref: (tile_n, C) tiles in VMEM
    # gamma_ref, beta_ref: (1, C) in VMEM
    g = gamma_ref[...].astype(jnp.float32)       # hoisted: load/cast once
    bt = beta_ref[...].astype(jnp.float32)

    x = a_ref[...].astype(jnp.float32) + b_ref[...].astype(jnp.float32)

    # Two-pass statistics (matches PyTorch LayerNorm, avoids cancellation):
    mean = jnp.sum(x, axis=-1, keepdims=True) * inv_c
    xc = x - mean
    var = jnp.sum(xc * xc, axis=-1, keepdims=True) * inv_c
    inv = jax.lax.rsqrt(var + eps)

    o_ref[...] = (xc * inv * g + bt).astype(o_ref.dtype)


def add_layernorm(x310, x317, gamma, beta, eps=1e-5):
    assert x310.shape == x317.shape
    orig_shape = x310.shape
    C = orig_shape[-1]
    N = 1
    for d in orig_shape[:-1]:
        N *= d

    a = x310.reshape(N, C)
    b = x317.reshape(N, C)
    g = gamma.reshape(1, C)
    bt = beta.reshape(1, C)

    # Tile selection:
    #  * N <= 512: a single block covering the whole array. A block_shape equal
    #    to the full array dims is exempt from the (8,128) divisibility rule,
    #    so no padding or output slicing is needed (module size N=196).
    #  * N  > 512: 512-row tiles (sublane-aligned). The ragged last tile is
    #    handled by Pallas' masked partial DMA/store — no padded copies in HBM.
    #    Keeps per-step VMEM ~4.5 MiB (fits every generation's default limit)
    #    and gives >=2 grid steps so "parallel" semantics can use both v7x TCs.
    if N <= 512:
        tile_n = N
    else:
        tile_n = 512

    grid = (pl.cdiv(N, tile_n),)

    cost = pl.CostEstimate(
        flops=10 * N * C,
        transcendentals=N,
        bytes_accessed=3 * N * C * x310.dtype.itemsize,
    )

    kernel = functools.partial(
        add_layernorm_kernel, eps=float(eps), inv_c=1.0 / float(C)
    )

    out = pl.pallas_call(
        kernel,
        out_shape=jax.ShapeDtypeStruct((N, C), x310.dtype),
        grid_spec=pltpu.PrefetchScalarGridSpec(
            num_scalar_prefetch=0,
            grid=grid,
            in_specs=[
                pl.BlockSpec((tile_n, C), lambda i: (i, 0)),
                pl.BlockSpec((tile_n, C), lambda i: (i, 0)),
                pl.BlockSpec((1, C), lambda i: (0, 0)),
                pl.BlockSpec((1, C), lambda i: (0, 0)),
            ],
            out_specs=pl.BlockSpec((tile_n, C), lambda i: (i, 0)),
        ),
        compiler_params=pltpu.CompilerParams(
            dimension_semantics=("parallel",)
        ),
        cost_estimate=cost,
    )(a, b, g, bt)

    return out.reshape(orig_shape)


def reference(x310, x317, gamma, beta, eps=1e-5):
    x = (x310 + x317).astype(jnp.float32)
    mean = jnp.mean(x, axis=-1, keepdims=True)
    var = jnp.mean((x - mean) ** 2, axis=-1, keepdims=True)
    y = (x - mean) / jnp.sqrt(var + eps)
    return y * gamma + beta


if __name__ == "__main__":
    key = jax.random.PRNGKey(0)
    k1, k2, k3, k4 = jax.random.split(key, 4)

    B, H, W, C = 1, 14, 14, 384
    x310 = jax.random.normal(k1, (B, H, W, C), dtype=jnp.float32)
    x317 = jax.random.normal(k2, (B, H, W, C), dtype=jnp.float32)

    # LayerNorm elementwise-affine params (deterministic init).
    gamma = 1.0 + 0.02 * jax.random.normal(k3, (C,), dtype=jnp.float32)
    beta = 0.02 * jax.random.normal(k4, (C,), dtype=jnp.float32)

    out = add_layernorm(x310, x317, gamma, beta)
    out = jax.block_until_ready(out)

    ref = reference(x310, x317, gamma, beta)
    assert out.shape == (B, H, W, C)
    assert jnp.allclose(out, ref, atol=2e-4, rtol=2e-4), "mismatch vs reference"

    print("KERNEL_OK")
</pallas_src>

<mosaic_0001>
module attributes {stable_mosaic.version = 11 : i64} {
  func.func @add_layernorm_kernel(%arg0: i32, %arg1: memref<196x384xf32, #tpu.memory_space<vmem>>, %arg2: memref<196x384xf32, #tpu.memory_space<vmem>>, %arg3: memref<1x384xf32, #tpu.memory_space<vmem>>, %arg4: memref<1x384xf32, #tpu.memory_space<vmem>>, %arg5: memref<196x384xf32, #tpu.memory_space<vmem>>) attributes {dimension_semantics = [#tpu.dimension_semantics<parallel>], iteration_bounds = array<i64: 1>, scalar_prefetch = 0 : i64, scratch_operands = 0 : i64, tpu.core_type = #tpu.core_type<tc>, window_params = [{transform_indices = @transform_0, window_bounds = array<i64: 196, 384>}, {transform_indices = @transform_1, window_bounds = array<i64: 196, 384>}, {pipeline_mode = #tpu.pipeline_mode<synchronous>, transform_indices = @transform_2, window_bounds = array<i64: 1, 384>}, {pipeline_mode = #tpu.pipeline_mode<synchronous>, transform_indices = @transform_3, window_bounds = array<i64: 1, 384>}, {transform_indices = @transform_4, window_bounds = array<i64: 196, 384>}]} {
    %c0 = arith.constant 0 : index
    %c0_0 = arith.constant 0 : index
    %0 = vector.load %arg3[%c0, %c0_0] : memref<1x384xf32, #tpu.memory_space<vmem>>, vector<1x384xf32>
    %c0_1 = arith.constant 0 : index
    %c0_2 = arith.constant 0 : index
    %1 = vector.load %arg4[%c0_1, %c0_2] : memref<1x384xf32, #tpu.memory_space<vmem>>, vector<1x384xf32>
    %c0_3 = arith.constant 0 : index
    %c0_4 = arith.constant 0 : index
    %2 = vector.load %arg1[%c0_3, %c0_4] : memref<196x384xf32, #tpu.memory_space<vmem>>, vector<196x384xf32>
    %c0_5 = arith.constant 0 : index
    %c0_6 = arith.constant 0 : index
    %3 = vector.load %arg2[%c0_5, %c0_6] : memref<196x384xf32, #tpu.memory_space<vmem>>, vector<196x384xf32>
    %4 = arith.addf %2, %3 : vector<196x384xf32>
    %cst = arith.constant dense<0.000000e+00> : vector<196xf32>
    %5 = vector.multi_reduction <add>, %4, %cst [1] : vector<196x384xf32> to vector<196xf32>
    %6 = vector.shape_cast %5 : vector<196xf32> to vector<196x1xf32>
    %cst_7 = arith.constant 0.00260416674 : f32
    %7 = vector.broadcast %cst_7 : f32 to vector<196x1xf32>
    %8 = arith.mulf %6, %7 : vector<196x1xf32>
    %9 = vector.broadcast %8 : vector<196x1xf32> to vector<196x384xf32>
    %10 = arith.subf %4, %9 : vector<196x384xf32>
    %11 = arith.mulf %10, %10 : vector<196x384xf32>
    %cst_8 = arith.constant dense<0.000000e+00> : vector<196xf32>
    %12 = vector.multi_reduction <add>, %11, %cst_8 [1] : vector<196x384xf32> to vector<196xf32>
    %13 = vector.shape_cast %12 : vector<196xf32> to vector<196x1xf32>
    %cst_9 = arith.constant 0.00260416674 : f32
    %14 = vector.broadcast %cst_9 : f32 to vector<196x1xf32>
    %15 = arith.mulf %13, %14 : vector<196x1xf32>
    %cst_10 = arith.constant 9.99999974E-6 : f32
    %16 = vector.broadcast %cst_10 : f32 to vector<196x1xf32>
    %17 = arith.addf %15, %16 : vector<196x1xf32>
    %18 = math.rsqrt %17 : vector<196x1xf32>
    %19 = vector.broadcast %18 : vector<196x1xf32> to vector<196x384xf32>
    %20 = arith.mulf %10, %19 : vector<196x384xf32>
    %21 = vector.broadcast %0 : vector<1x384xf32> to vector<196x384xf32>
    %22 = arith.mulf %20, %21 : vector<196x384xf32>
    %23 = vector.broadcast %1 : vector<1x384xf32> to vector<196x384xf32>
    %24 = arith.addf %22, %23 : vector<196x384xf32>
    %c0_11 = arith.constant 0 : index
    %c0_12 = arith.constant 0 : index
    %25 = vector.load %arg5[%c0_11, %c0_12] : memref<196x384xf32, #tpu.memory_space<vmem>>, vector<196x384xf32>
    tpu.vector_store %arg5[%c0_11, %c0_12], %24 {strides = array<i32>} : memref<196x384xf32, #tpu.memory_space<vmem>>, vector<196x384xf32>,
    return
  }
  func.func @transform_0(%arg0: i32) -> (i32, i32) {
    %c0_i32 = arith.constant 0 : i32
    %c0_i32_0 = arith.constant 0 : i32
    return %arg0, %c0_i32 : i32, i32
  }
  func.func @transform_1(%arg0: i32) -> (i32, i32) {
    %c0_i32 = arith.constant 0 : i32
    %c0_i32_0 = arith.constant 0 : i32
    return %arg0, %c0_i32 : i32, i32
  }
  func.func @transform_2(%arg0: i32) -> (i32, i32) {
    %c0_i32 = arith.constant 0 : i32
    %c0_i32_0 = arith.constant 0 : i32
    %c0_i32_1 = arith.constant 0 : i32
    return %c0_i32, %c0_i32_0 : i32, i32
  }
  func.func @transform_3(%arg0: i32) -> (i32, i32) {
    %c0_i32 = arith.constant 0 : i32
    %c0_i32_0 = arith.constant 0 : i32
    %c0_i32_1 = arith.constant 0 : i32
    return %c0_i32, %c0_i32_0 : i32, i32
  }
  func.func @transform_4(%arg0: i32) -> (i32, i32) {
    %c0_i32 = arith.constant 0 : i32
    %c0_i32_0 = arith.constant 0 : i32
    return %arg0, %c0_i32 : i32, i32
  }
}

</mosaic_0001>

<bundles_post_ra>
// kernel: tpu_custom_call.1
= control target key start
LH: loop header
LB: loop body
LE: loop exit
PB: predicated region body
PF: predicated region fallthrough
CT: control target
= control target key end

     0   :  { %9 = vsyncpa [#allocation3], 0  ;;  %s2723_s0 = inlined_call_operand.hbm [shape: f32[196,384], index: 0, kind: input, shape index: {}]   ;;  %s2724_s1 = inlined_call_operand.hbm [shape: f32[196,384], index: 1, kind: input, shape index: {}]   ;;  %s2725_s2 = inlined_call_operand.hbm [shape: f32[1,384], index: 2, kind: input, shape index: {}]   ;;  %s2726_s3 = inlined_call_operand.hbm [shape: f32[1,384], index: 3, kind: input, shape index: {}]   ;;  %s2727_s4 = inlined_call_operand.hbm [shape: f32[196,384], index: 4, kind: output, shape index: {}]  }
   0x1   :  { %10 = vsyncpa [#allocation6], 0 }
   0x2   :  { %11 = vsyncpa [#allocation9], 0 }
   0x3   :  { %12 = vsyncpa [#allocation4], 0  ;;  %s30_s17 = sshll.u32 %s2724_s1, 4  ;;  %s1506_s18 = smov [#allocation5]   ;;  %s31_s17 = int_to_ptr.hbm [resolvable:$true] %s30_s17 }
   0x4   :  { %s32_s19 = sshll.u32 %s1506_s18, 4  ;;  %s17_s22 = sshll.u32 %s2723_s0, 4  ;;  %s33_s19 = int_to_ptr.vmem [resolvable:$true] %s32_s19  ;;  %s18_s22 = int_to_ptr.hbm [resolvable:$true] %s17_s22 }
   0x5   :  { %s1507_s23 = smov 384   ;;  %s1508_s24 = smov 24  }
   0x6   :  { %38 = dma.hbm_to_vmem [thread:$0]  %s31_s17, 9600, %s33_s19, [#allocation6], %s1507_s23, %s1507_s23, %s1508_s24  }
   0x7   :  { %s1509_s25 = smov [#allocation2]   ;;  %s44_s1 = sshll.u32 %s2725_s2, 4  ;;  %s45_s1 = int_to_ptr.hbm [resolvable:$true] %s44_s1 }
   0x8   :  { %s19_s26 = sshll.u32 %s1509_s25, 4  ;;  %s55_s30 = sshll.u32 %s2726_s3, 4  ;;  %s20_s26 = int_to_ptr.vmem [resolvable:$true] %s19_s26  ;;  %s56_s30 = int_to_ptr.hbm [resolvable:$true] %s55_s30 }
   0x9   :  { %25 = dma.hbm_to_vmem [thread:$0]  %s18_s22, 9600, %s20_s26, [#allocation3], %s1507_s23, %s1507_s23, %s1508_s24  }
   0xa   :  { %s1510_s5 = smov [#allocation7]   ;;  %s1511_s7 = smov [#allocation8]  }
   0xb   :  { %s46_s6 = sshll.u32 %s1510_s5, 4  ;;  %s57_s8 = sshll.u32 %s1511_s7, 4  ;;  %s47_s6 = int_to_ptr.vmem [resolvable:$true] %s46_s6  ;;  %s58_s8 = int_to_ptr.vmem [resolvable:$true] %s57_s8 }
   0xc   :  { %49 = dma.hbm_to_vmem [thread:$0]  %s45_s1, 48, %s47_s6, [#allocation6]  }
   0xd   :  { %60 = dma.hbm_to_vmem [thread:$0]  %s56_s30, 48, %s58_s8, [#allocation9]  }
   0xe   :  { %1498 = dma.done.wait [#allocation3], 9600  }
   0xf   :  { %1499 = vsyncadd [#allocation3], 4294957696 }
  0x10   :  { %1500 = dma.done.wait [#allocation6], 9648  }
  0x11   :  { %1501 = vsyncadd [#allocation6], 4294957648 }
  0x12   :  { %1502 = dma.done.wait [#allocation9], 48  }
  0x13   :  { %1503 = vsyncadd [#allocation9], 4294967248  ;;  %v91_v0 = vld [vmem:[#allocation2 + $0x60] sm:$0xff]  ;;  %v92_v1 = vld [vmem:[#allocation2 + $0x68] sm:$0xff]  ;;  %vm400_vm0 = vcmask 1043456   ;;  %s1512_s2 = smov [#allocation10]  }
  0x14   :  { %v93_v2 = vld [vmem:[#allocation2 + $0x70] sm:$0xff]  ;;  %v166_v3 = vld [vmem:[#allocation5 + $0x60] sm:$0xff]  ;;  %v167_v4 = vld [vmem:[#allocation5 + $0x68] sm:$0xff]  ;;  %s1304_s3 = sshll.u32 %s1512_s2, 4  ;;  %s1306_s11 = sshll.u32 %s2727_s4, 4  ;;  %s1305_s3 = int_to_ptr.vmem [resolvable:$true] %s1304_s3  ;;  %s1307_s11 = int_to_ptr.hbm [resolvable:$true] %s1306_s11 }
  0x15   :  { %v168_v5 = vld [vmem:[#allocation5 + $0x70] sm:$0xff]  ;;  %v1556_v6 = vadd.f32 %v166_v3, %v91_v0  ;;  %v1558_v7 = vadd.f32 %v167_v4, %v92_v1  ;;  %v85_v9 = vld [vmem:[#allocation2 + $0x30] sm:$0xff]  ;;  %v86_v10 = vld [vmem:[#allocation2 + $0x38] sm:$0xff] }
  0x16   :  { %v1560_v8 = vadd.f32 %v168_v5, %v93_v2  ;;  %v87_v11 = vld [vmem:[#allocation2 + $0x40] sm:$0xff]  ;;  %v160_v12 = vld [vmem:[#allocation5 + $0x30] sm:$0xff]  ;;  %v161_v13 = vld [vmem:[#allocation5 + $0x38] sm:$0xff] }
  0x17   :  { %v162_v14 = vld [vmem:[#allocation5 + $0x40] sm:$0xff]  ;;  %v320_v15 = vadd.f32 %v1558_v7, %v1556_v6  ;;  %v1564_v16 = vadd.f32 %v160_v12, %v85_v9  ;;  %v1566_v17 = vadd.f32 %v161_v13, %v86_v10  ;;  %v79_v19 = vld [vmem:[#allocation2] sm:$0xff]  ;;  %v80_v20 = vld [vmem:[#allocation2 + $0x8] sm:$0xff] }
  0x18   :  { %v1568_v18 = vadd.f32 %v162_v14, %v87_v11  ;;  %v81_v21 = vld [vmem:[#allocation2 + $0x10] sm:$0xff]  ;;  %v154_v22 = vld [vmem:[#allocation5] sm:$0xff]  ;;  %v155_v23 = vld [vmem:[#allocation5 + $0x8] sm:$0xff] }
  0x19   :  { %v156_v24 = vld [vmem:[#allocation5 + $0x10] sm:$0xff]  ;;  %v321_v25 = vadd.f32 %v320_v15, %v1560_v8  ;;  %v312_v26 = vadd.f32 %v1566_v17, %v1564_v16  ;;  %v1573_v27 = vadd.f32 %v154_v22, %v79_v19  ;;  %v1575_v28 = vadd.f32 %v155_v23, %v80_v20  ;;  %v94_v29 = vld [vmem:[#allocation2 + $0x78] sm:$0xff]  ;;  %v95_v30 = vld [vmem:[#allocation2 + $0x80] sm:$0xff] }
  0x1a   :  { %v96_v31 = vld [vmem:[#allocation2 + $0x88] sm:$0xff]  ;;  %v1577_v32 = vadd.f32 %v156_v24, %v81_v21  ;;  %v169_v33 = vld [vmem:[#allocation5 + $0x78] sm:$0xff]  ;;  %v170_v34 = vld [vmem:[#allocation5 + $0x80] sm:$0xff] }
  0x1b   :  { %v171_v35 = vld [vmem:[#allocation5 + $0x88] sm:$0xff]  ;;  %322 = vadd.xlane.f32.xlu2 %v321_v25  ;;  %v313_v36 = vadd.f32 %v312_v26, %v1568_v18  ;;  %v304_v37 = vadd.f32 %v1575_v28, %v1573_v27  ;;  %v1582_v38 = vadd.f32 %v169_v33, %v94_v29  ;;  %v1584_v39 = vadd.f32 %v170_v34, %v95_v30  ;;  %v88_v40 = vld [vmem:[#allocation2 + $0x48] sm:$0xff]  ;;  %v89_v41 = vld [vmem:[#allocation2 + $0x50] sm:$0xff] }
  0x1c   :  { %v90_v42 = vld [vmem:[#allocation2 + $0x58] sm:$0xff]  ;;  %v1586_v43 = vadd.f32 %v171_v35, %v96_v31  ;;  %v163_v44 = vld [vmem:[#allocation5 + $0x48] sm:$0xff]  ;;  %v164_v45 = vld [vmem:[#allocation5 + $0x50] sm:$0xff] }
  0x1d   :  { %v165_v46 = vld [vmem:[#allocation5 + $0x58] sm:$0xff]  ;;  %314 = vadd.xlane.f32.xlu1 %v313_v36  ;;  %v305_v47 = vadd.f32 %v304_v37, %v1577_v32  ;;  %v324_v48 = vadd.f32 %v1584_v39, %v1582_v38  ;;  %v1591_v49 = vadd.f32 %v163_v44, %v88_v40  ;;  %v1593_v50 = vadd.f32 %v164_v45, %v89_v41  ;;  %v82_v51 = vld [vmem:[#allocation2 + $0x18] sm:$0xff]  ;;  %v83_v52 = vld [vmem:[#allocation2 + $0x20] sm:$0xff] }
  0x1e   :  { %v84_v53 = vld [vmem:[#allocation2 + $0x28] sm:$0xff]  ;;  %v1595_v54 = vadd.f32 %v165_v46, %v90_v42  ;;  %v157_v55 = vld [vmem:[#allocation5 + $0x18] sm:$0xff]  ;;  %v158_v56 = vld [vmem:[#allocation5 + $0x20] sm:$0xff] }
  0x1f   :  { %v159_v57 = vld [vmem:[#allocation5 + $0x28] sm:$0xff]  ;;  %306 = vadd.xlane.f32.xlu0 %v305_v47  ;;  %v325_v58 = vadd.f32 %v324_v48, %v1586_v43  ;;  %v316_v59 = vadd.f32 %v1593_v50, %v1591_v49  ;;  %v1600_v60 = vadd.f32 %v157_v55, %v82_v51  ;;  %v1602_v61 = vadd.f32 %v158_v56, %v83_v52  ;;  %v104_v63 = vld [vmem:[#allocation2 + $0xc8] sm:$0xff]  ;;  %v105_v0 = vld [vmem:[#allocation2 + $0xd0] sm:$0xff] }
  0x20   :  { %v103_v62 = vld [vmem:[#allocation2 + $0xc0] sm:$0xff]  ;;  %v1604_v1 = vadd.f32 %v159_v57, %v84_v53  ;;  %v178_v2 = vld [vmem:[#allocation5 + $0xc0] sm:$0xff]  ;;  %v180_v4 = vld [vmem:[#allocation5 + $0xd0] sm:$0xff] }
  0x21   :  { %v179_v3 = vld [vmem:[#allocation5 + $0xc8] sm:$0xff]  ;;  %v317_v5 = vadd.f32 %v316_v59, %v1595_v54  ;;  %v308_v9 = vadd.f32 %v1602_v61, %v1600_v60  ;;  %v1609_v10 = vadd.f32 %v178_v2, %v103_v62  ;;  %v100_v12 = vld [vmem:[#allocation2 + $0xa8] sm:$0xff]  ;;  %v101_v13 = vld [vmem:[#allocation2 + $0xb0] sm:$0xff]  ;;  %v1613_v15 = vadd.f32 %v180_v4, %v105_v0 }
  0x22   :  { %v1611_v11 = vadd.f32 %v179_v3, %v104_v63  ;;  %v102_v14 = vld [vmem:[#allocation2 + $0xb8] sm:$0xff]  ;;  %v175_v19 = vld [vmem:[#allocation5 + $0xa8] sm:$0xff]  ;;  %v176_v20 = vld [vmem:[#allocation5 + $0xb0] sm:$0xff] }
  0x23   :  { %v177_v21 = vld [vmem:[#allocation5 + $0xb8] sm:$0xff]  ;;  %326 = vadd.xlane.f32.xlu2 %v325_v58  ;;  %v309_v22 = vadd.f32 %v308_v9, %v1604_v1  ;;  %v1618_v24 = vadd.f32 %v175_v19, %v100_v12  ;;  %v1620_v25 = vadd.f32 %v176_v20, %v101_v13  ;;  %v98_v29 = vld [vmem:[#allocation2 + $0x98] sm:$0xff]  ;;  %v99_v30 = vld [vmem:[#allocation2 + $0xa0] sm:$0xff] }
  0x24   :  { %v336_v23 = vadd.f32 %v1611_v11, %v1609_v10  ;;  %v97_v26 = vld [vmem:[#allocation2 + $0x90] sm:$0xff]  ;;  %v172_v31 = vld [vmem:[#allocation5 + $0x90] sm:$0xff]  ;;  %v174_v34 = vld [vmem:[#allocation5 + $0xa0] sm:$0xff]  ;;  %v1622_v35 = vadd.f32 %v177_v21, %v102_v14 }
  0x25   :  { %v173_v33 = vld [vmem:[#allocation5 + $0x98] sm:$0xff]  ;;  %318 = vadd.xlane.f32.xlu1 %v317_v5  ;;  %v332_v36 = vadd.f32 %v1620_v25, %v1618_v24  ;;  %v1626_v37 = vadd.f32 %v172_v31, %v97_v26  ;;  %v151_v41 = vld [vmem:[#allocation2 + $0x240] sm:$0xf]  ;;  %v152_v42 = vld [vmem:[#allocation2 + $0x248] sm:$0xf]  ;;  %v1630_v45 = vadd.f32 %v174_v34, %v99_v30 }
  0x26   :  { %v1628_v40 = vadd.f32 %v173_v33, %v98_v29  ;;  %v153_v44 = vld [vmem:[#allocation2 + $0x250] sm:$0xf]  ;;  %v226_v46 = vld [vmem:[#allocation5 + $0x240] sm:$0xf]  ;;  %v227_v47 = vld [vmem:[#allocation5 + $0x248] sm:$0xf]  ;;  %v337_v51 = vadd.f32 %v336_v23, %v1613_v15 }
  0x27   :  { %v228_v48 = vld [vmem:[#allocation5 + $0x250] sm:$0xf]  ;;  %310 = vadd.xlane.f32.xlu0 %v309_v22  ;;  %v1635_v53 = vadd.f32 %v226_v46, %v151_v41  ;;  %v1637_v55 = vadd.f32 %v227_v47, %v152_v42  ;;  %v106_v56 = vld [vmem:[#allocation2 + $0xd8] sm:$0xff]  ;;  %v107_v57 = vld [vmem:[#allocation2 + $0xe0] sm:$0xff]  ;;  %v333_v62 = vadd.f32 %v332_v36, %v1622_v35 }
  0x28   :  { %v328_v52 = vadd.f32 %v1628_v40, %v1626_v37  ;;  %v181_v58 = vld [vmem:[#allocation5 + $0xd8] sm:$0xff]  ;;  %v182_v59 = vld [vmem:[#allocation5 + $0xe0] sm:$0xff]  ;;  %v1640_v63 = vadd.f32 %v228_v48, %v153_v44  ;;  %v111_v5 = vld [vmem:[#allocation2 + $0x100] sm:$0xff] }
  0x29   :  { %2799 = vst [vmem:[#allocation15_spill] sm:$0xff] %v1635_v53  ;;  %v401_v0 = vsel %vm400_vm0, %v1635_v53, 0.0  ;;  %v402_v2 = vsel %vm400_vm0, %v1637_v55, 0.0  ;;  %v109_v3 = vld [vmem:[#allocation2 + $0xf0] sm:$0xff]  ;;  %v110_v4 = vld [vmem:[#allocation2 + $0xf8] sm:$0xff]  ;;  %v1647_v12 = vadd.f32 %v181_v58, %v106_v56  ;;  %v184_v13 = vld [vmem:[#allocation5 + $0xf0] sm:$0xff]  ;;  %v1649_v21 = vadd.f32 %v182_v59, %v107_v57 }
  0x2a   :  { %2800 = vst [vmem:[#allocation16_spill] sm:$0xff] %v1637_v55  ;;  %v329_v9 = vadd.f32 %v328_v52, %v1630_v45  ;;  %v185_v14 = vld [vmem:[#allocation5 + $0xf8] sm:$0xff]  ;;  %v186_v19 = vld [vmem:[#allocation5 + $0x100] sm:$0xff]  ;;  %v108_v20 = vld [vmem:[#allocation2 + $0xe8] sm:$0xff]  ;;  %v1651_v22 = vadd.f32 %v184_v13, %v109_v3  ;;  %v403_v29 = vadd.f32 %v402_v2, %v401_v0  ;;  %v404_v34 = vsel %vm400_vm0, %v1640_v63, 0.0 }
  0x2b   :  { %2801 = vst [vmem:[#allocation17_spill] sm:$0xff] %v1640_v63  ;;  %338 = vadd.xlane.f32.xlu2 %v337_v51  ;;  %v1653_v23 = vadd.f32 %v185_v14, %v110_v4  ;;  %v1655_v26 = vadd.f32 %v186_v19, %v111_v5  ;;  %v183_v30 = vld [vmem:[#allocation5 + $0xe8] sm:$0xff]  ;;  %v116_v33 = vld [vmem:[#allocation2 + $0x128] sm:$0xff]  ;;  %v190_v41 = vld [vmem:[#allocation5 + $0x120] sm:$0xff]  ;;  %v340_v52 = vadd.f32 %v1649_v21, %v1647_v12 }
  0x2c   :  { %v115_v31 = vld [vmem:[#allocation2 + $0x120] sm:$0xff]  ;;  %v112_v44 = vld [vmem:[#allocation2 + $0x108] sm:$0xff]  ;;  %v113_v46 = vld [vmem:[#allocation2 + $0x110] sm:$0xff]  ;;  %v1661_v51 = vadd.f32 %v183_v30, %v108_v20 }
  0x2d   :  { %334 = vadd.xlane.f32.xlu1 %v333_v62  ;;  %v344_v36 = vadd.f32 %v1653_v23, %v1651_v22  ;;  %v191_v42 = vld [vmem:[#allocation5 + $0x128] sm:$0xff]  ;;  %v188_v48 = vld [vmem:[#allocation5 + $0x110] sm:$0xff]  ;;  %v118_v57 = vld [vmem:[#allocation2 + $0x138] sm:$0xff]  ;;  %v405_v62 = vadd.f32 %v404_v34, %v403_v29  ;;  %v1666_v4 = vadd.f32 %v190_v41, %v115_v31 }
  0x2e   :  { %v187_v47 = vld [vmem:[#allocation5 + $0x108] sm:$0xff]  ;;  %v120_v59 = vld [vmem:[#allocation2 + $0x148] sm:$0xff]  ;;  %v193_v0 = vld [vmem:[#allocation5 + $0x138] sm:$0xff]  ;;  %v1668_v5 = vadd.f32 %v191_v42, %v116_v33  ;;  %v1676_v30 = vadd.f32 %v188_v48, %v113_v46 }
  0x2f   :  { %330 = vadd.xlane.f32.xlu0 %v329_v9  ;;  %v345_v56 = vadd.f32 %v344_v36, %v1655_v26  ;;  %v119_v58 = vld [vmem:[#allocation2 + $0x140] sm:$0xff]  ;;  %v194_v2 = vld [vmem:[#allocation5 + $0x140] sm:$0xff]  ;;  %v1670_v13 = vadd.f32 %v193_v0, %v118_v57  ;;  %v117_v14 = vld [vmem:[#allocation2 + $0x130] sm:$0xff]  ;;  %v1674_v20 = vadd.f32 %v187_v47, %v112_v44  ;;  %v341_v36 = vadd.f32 %v340_v52, %v1661_v51 }
  0x30   :  { %v195_v3 = vld [vmem:[#allocation5 + $0x148] sm:$0xff]  ;;  %2802 = vst [vmem:[#allocation18_spill] sm:$0xff] %v1668_v5  ;;  %v1672_v9 = vadd.f32 %v194_v2, %v119_v58  ;;  %v192_v19 = vld [vmem:[#allocation5 + $0x130] sm:$0xff]  ;;  %v114_v29 = vld [vmem:[#allocation2 + $0x118] sm:$0xff]  ;;  %v352_v44 = vadd.f32 %v1668_v5, %v1666_v4 }
  0x31   :  { %2803 = vst [vmem:[#allocation19_spill] sm:$0xff] %v1670_v13  ;;  %v189_v34 = vld [vmem:[#allocation5 + $0x118] sm:$0xff]  ;;  %v1679_v63 = vadd.f32 %v195_v3, %v120_v59  ;;  %v124_v33 = vld [vmem:[#allocation2 + $0x168] sm:$0xff]  ;;  %v1683_v42 = vadd.f32 %v192_v19, %v117_v14  ;;  %v199_v46 = vld [vmem:[#allocation5 + $0x168] sm:$0xff] }
  0x32   :  { %2804 = vst [vmem:[#allocation20_spill] sm:$0xff] %v1672_v9  ;;  %v356_v31 = vadd.f32 %v1672_v9, %v1670_v13  ;;  %v125_v41 = vld [vmem:[#allocation2 + $0x170] sm:$0xff]  ;;  %v127_v47 = vld [vmem:[#allocation2 + $0x180] sm:$0xff]  ;;  %v128_v48 = vld [vmem:[#allocation2 + $0x188] sm:$0xff]  ;;  %v1687_v52 = vadd.f32 %v189_v34, %v114_v29  ;;  %v1697_v9 = vadd.f32 %v199_v46, %v124_v33 }
  0x33   :  { %2805 = vst [vmem:[#allocation21_spill] sm:$0xff] %v1674_v20  ;;  %346 = vadd.xlane.f32.xlu2 %v345_v56  ;;  %v348_v56 = vadd.f32 %v1676_v30, %v1674_v20  ;;  %v200_v57 = vld [vmem:[#allocation5 + $0x170] sm:$0xff]  ;;  %v202_v58 = vld [vmem:[#allocation5 + $0x180] sm:$0xff]  ;;  %v203_v59 = vld [vmem:[#allocation5 + $0x188] sm:$0xff]  ;;  %v353_v34 = vadd.f32 %v352_v44, %v1683_v42 }
  0x34   :  { %2806 = vst [vmem:[#allocation22_spill] sm:$0xff] %v1676_v30  ;;  %v357_v0 = vadd.f32 %v356_v31, %v1679_v63  ;;  %v122_v2 = vld [vmem:[#allocation2 + $0x158] sm:$0xff]  ;;  %v196_v3 = vld [vmem:[#allocation5 + $0x150] sm:$0xff]  ;;  %v1692_v14 = vadd.f32 %v202_v58, %v127_v47  ;;  %v1694_v19 = vadd.f32 %v203_v59, %v128_v48  ;;  %v197_v55 = vld [vmem:[#allocation5 + $0x158] sm:$0xff]  ;;  %v1699_v13 = vadd.f32 %v200_v57, %v125_v41 }
  0x35   :  { %2807 = vst [vmem:[#allocation23_spill] sm:$0xff] %v1679_v63  ;;  %406 = vadd.xlane.f32.xlu1 %v405_v62  ;;  %v121_v62 = vld [vmem:[#allocation2 + $0x150] sm:$0xff]  ;;  %v204_v29 = vld [vmem:[#allocation5 + $0x190] sm:$0xff]  ;;  %v126_v30 = vld [vmem:[#allocation2 + $0x178] sm:$0xff]  ;;  %v1704_v48 = vadd.f32 %v197_v55, %v122_v2 }
  0x36   :  { %2808 = vst [vmem:[#allocation24_spill] sm:$0xff] %v1683_v42  ;;  %v129_v53 = vld [vmem:[#allocation2 + $0x190] sm:$0xff]  ;;  %v123_v63 = vld [vmem:[#allocation2 + $0x160] sm:$0xff]  ;;  %v198_v20 = vld [vmem:[#allocation5 + $0x160] sm:$0xff]  ;;  %v1702_v47 = vadd.f32 %v196_v3, %v121_v62  ;;  %v368_v44 = vadd.f32 %v1694_v19, %v1692_v14  ;;  %v364_v59 = vadd.f32 %v1699_v13, %v1697_v9 }
  0x37   :  { %2809 = vst [vmem:[#allocation25_spill] sm:$0xff] %v1687_v52  ;;  %342 = vadd.xlane.f32.xlu0 %v341_v36  ;;  %v349_v36 = vadd.f32 %v348_v56, %v1687_v52  ;;  %v201_v31 = vld [vmem:[#allocation5 + $0x178] sm:$0xff]  ;;  %v1706_v58 = vadd.f32 %v204_v29, %v129_v53  ;;  %v136_v33 = vld [vmem:[#allocation2 + $0x1c8] sm:$0xff]  ;;  %v211_v41 = vld [vmem:[#allocation5 + $0x1c8] sm:$0xff]  ;;  %v1714_v3 = vadd.f32 %v198_v20, %v123_v63 }
  0x38   :  { %2810 = vst [vmem:[#allocation26_spill] sm:$0xff] %v1692_v14  ;;  %v137_v46 = vld [vmem:[#allocation2 + $0x1d0] sm:$0xff]  ;;  %v212_v57 = vld [vmem:[#allocation5 + $0x1d0] sm:$0xff]  ;;  %v1710_v56 = vadd.f32 %v201_v31, %v126_v30  ;;  %v134_v62 = vld [vmem:[#allocation2 + $0x1b8] sm:$0xff]  ;;  %v360_v29 = vadd.f32 %v1704_v48, %v1702_v47  ;;  %v1719_v31 = vadd.f32 %v211_v41, %v136_v33 }
  0x39   :  { %2811 = vst [vmem:[#allocation27_spill] sm:$0xff] %v1694_v19  ;;  %v208_v55 = vld [vmem:[#allocation5 + $0x1b0] sm:$0xff]  ;;  %v209_v53 = vld [vmem:[#allocation5 + $0x1b8] sm:$0xff]  ;;  %v130_v2 = vld [vmem:[#allocation2 + $0x198] sm:$0xff]  ;;  %v369_v19 = vadd.f32 %v368_v44, %v1706_v58  ;;  %v1721_v52 = vadd.f32 %v212_v57, %v137_v46 }
  0x3a   :  { %2812 = vst [vmem:[#allocation28_spill] sm:$0xff] %v1697_v9  ;;  %v131_v14 = vld [vmem:[#allocation2 + $0x1a0] sm:$0xff]  ;;  %v206_v30 = vld [vmem:[#allocation5 + $0x1a0] sm:$0xff]  ;;  %v213_v9 = vld [vmem:[#allocation5 + $0x1d8] sm:$0xff]  ;;  %v365_v63 = vadd.f32 %v364_v59, %v1710_v56  ;;  %v1726_v42 = vadd.f32 %v209_v53, %v134_v62 }
  0x3b   :  { %2813 = vst [vmem:[#allocation29_spill] sm:$0xff] %v1699_v13  ;;  %358 = vadd.xlane.f32.xlu2 %v357_v0  ;;  %v133_v0 = vld [vmem:[#allocation2 + $0x1b0] sm:$0xff]  ;;  %v138_v13 = vld [vmem:[#allocation2 + $0x1d8] sm:$0xff]  ;;  %v1730_v44 = vadd.f32 %v206_v30, %v131_v14  ;;  %v132_v33 = vld [vmem:[#allocation2 + $0x1a8] sm:$0xff]  ;;  %v380_v57 = vadd.f32 %v1721_v52, %v1719_v31 }
  0x3c   :  { %2814 = vst [vmem:[#allocation30_spill] sm:$0xff] %v1704_v48  ;;  %v1724_v20 = vadd.f32 %v208_v55, %v133_v0  ;;  %v210_v5 = vld [vmem:[#allocation5 + $0x1c0] sm:$0xff]  ;;  %v207_v46 = vld [vmem:[#allocation5 + $0x1a8] sm:$0xff]  ;;  %v1733_v41 = vadd.f32 %v213_v9, %v138_v13  ;;  %v145_v59 = vld [vmem:[#allocation2 + $0x210] sm:$0xff] }
  0x3d   :  { %2815 = vst [vmem:[#allocation31_spill] sm:$0xff] %v1706_v58  ;;  %354 = vadd.xlane.f32.xlu1 %v353_v34  ;;  %v205_v34 = vld [vmem:[#allocation5 + $0x198] sm:$0xff]  ;;  %v361_v58 = vadd.f32 %v360_v29, %v1714_v3  ;;  %v146_v0 = vld [vmem:[#allocation2 + $0x218] sm:$0xff]  ;;  %v220_v62 = vld [vmem:[#allocation5 + $0x210] sm:$0xff]  ;;  %v1741_v29 = vadd.f32 %v207_v46, %v132_v33 }
  0x3e   :  { %2816 = vst [vmem:[#allocation32_spill] sm:$0xff] %v1714_v3  ;;  %v1728_v48 = vadd.f32 %v205_v34, %v130_v2  ;;  %v221_v55 = vld [vmem:[#allocation5 + $0x218] sm:$0xff]  ;;  %v376_v14 = vadd.f32 %v1726_v42, %v1724_v20  ;;  %v142_v2 = vld [vmem:[#allocation2 + $0x1f8] sm:$0xff]  ;;  %v143_v9 = vld [vmem:[#allocation2 + $0x200] sm:$0xff]  ;;  %v381_v30 = vadd.f32 %v380_v57, %v1733_v41 }
  0x3f   :  { %350 = vadd.xlane.f32.xlu0 %v349_v36  ;;  %2817 = vst [vmem:[#allocation33_spill] sm:$0xff] %v1719_v31  ;;  %v135_v36 = vld [vmem:[#allocation2 + $0x1c0] sm:$0xff]  ;;  %v218_v34 = vld [vmem:[#allocation5 + $0x200] sm:$0xff]  ;;  %v140_v31 = vld [vmem:[#allocation2 + $0x1e8] sm:$0xff] }
  0x40   :  { %2818 = vst [vmem:[#allocation34_spill] sm:$0xff] %v1721_v52  ;;  %v1737_v53 = vadd.f32 %v210_v5, %v135_v36  ;;  %v372_v13 = vadd.f32 %v1730_v44, %v1728_v48  ;;  %v139_v52 = vld [vmem:[#allocation2 + $0x1e0] sm:$0xff]  ;;  %v1746_v5 = vadd.f32 %v220_v62, %v145_v59  ;;  %v1748_v36 = vadd.f32 %v221_v55, %v146_v0  ;;  %v222_v33 = vld [vmem:[#allocation5 + $0x220] sm:$0xff]  ;;  %v141_v55 = vld [vmem:[#allocation2 + $0x1f0] sm:$0xff] }
  0x41   :  { %2819 = vst [vmem:[#allocation35_spill] sm:$0xff] %v1724_v20  ;;  %v147_v20 = vld [vmem:[#allocation2 + $0x220] sm:$0xff] }
  0x42   :  { %2820 = vst [vmem:[#allocation36_spill] sm:$0xff] %v1726_v42  ;;  %v215_v42 = vld [vmem:[#allocation5 + $0x1e8] sm:$0xff]  ;;  %v377_v46 = vadd.f32 %v376_v14, %v1737_v53  ;;  %v1760_v0 = vadd.f32 %v222_v33, %v147_v20  ;;  %v392_v62 = vadd.f32 %v1748_v36, %v1746_v5  ;;  %v216_v14 = vld [vmem:[#allocation5 + $0x1f0] sm:$0xff]  ;;  %v149_v20 = vld [vmem:[#allocation2 + $0x230] sm:$0xff] }
  0x43   :  { %2821 = vst [vmem:[#allocation37_spill] sm:$0xff] %v1728_v48  ;;  %370 = vadd.xlane.f32.xlu2 %v369_v19  ;;  %v217_v19 = vld [vmem:[#allocation5 + $0x1f8] sm:$0xff]  ;;  %v144_v48 = vld [vmem:[#allocation2 + $0x208] sm:$0xff]  ;;  %v219_v57 = vld [vmem:[#allocation5 + $0x208] sm:$0xff]  ;;  %v1758_v59 = vadd.f32 %v215_v42, %v140_v31 }
  0x44   :  { %2822 = vst [vmem:[#allocation38_spill] sm:$0xff] %v1730_v44  ;;  %v1751_v3 = vadd.f32 %v217_v19, %v142_v2  ;;  %v1753_v44 = vadd.f32 %v218_v34, %v143_v9  ;;  %v1764_v2 = vadd.f32 %v219_v57, %v144_v48  ;;  %v1768_v9 = vadd.f32 %v216_v14, %v141_v55  ;;  %v148_v31 = vld [vmem:[#allocation2 + $0x228] sm:$0xff]  ;;  %v223_v19 = vld [vmem:[#allocation5 + $0x228] sm:$0xff] }
  0x45   :  { %2823 = vst [vmem:[#allocation39_spill] sm:$0xff] %v1733_v41  ;;  %366 = vadd.xlane.f32.xlu1 %v365_v63  ;;  %v214_v63 = vld [vmem:[#allocation5 + $0x1e0] sm:$0xff]  ;;  %v224_v34 = vld [vmem:[#allocation5 + $0x230] sm:$0xff] }
  0x46   :  { %v1756_v41 = vadd.f32 %v214_v63, %v139_v52  ;;  %v393_v52 = vadd.f32 %v392_v62, %v1760_v0  ;;  %v1775_v63 = vadd.f32 %v223_v19, %v148_v31  ;;  %v1777_v33 = vadd.f32 %v224_v34, %v149_v20 }
  0x47   :  { %362 = vadd.xlane.f32.xlu0 %v361_v58  ;;  %v373_v58 = vadd.f32 %v372_v13, %v1741_v29  ;;  %v388_v13 = vadd.f32 %v1753_v44, %v1751_v3 }
  0x48   :  { %v384_v42 = vadd.f32 %v1758_v59, %v1756_v41  ;;  %v396_v62 = vadd.f32 %v1777_v33, %v1775_v63 }
  0x4a   :  { %v385_v48 = vadd.f32 %v384_v42, %v1768_v9 }
  0x4b   :  { %382 = vadd.xlane.f32.xlu2 %v381_v30  ;;  %v389_v30 = vadd.f32 %v388_v13, %v1764_v2 }
  0x4d   :  { %378 = vadd.xlane.f32.xlu1 %v377_v46  ;;  %v150_v46 = vld [vmem:[#allocation2 + $0x238] sm:$0xff] }
  0x4f   :  { %374 = vadd.xlane.f32.xlu0 %v373_v58  ;;  %v225_v58 = vld [vmem:[#allocation5 + $0x238] sm:$0xff] }
  0x50   :  { %v1779_v57 = vadd.f32 %v225_v58, %v150_v46 }
  0x52   :  { %v397_v55 = vadd.f32 %v396_v62, %v1779_v57 }
  0x53   :  { %394 = vadd.xlane.f32.xlu2 %v393_v52 }
  0x55   :  { %390 = vadd.xlane.f32.xlu1 %v389_v30 }
  0x57   :  { %386 = vadd.xlane.f32.xlu0 %v385_v48 }
  0x5f   :  { %398 = vadd.xlane.f32.xlu0 %v397_v55 }
  0x8e   :  { %v323_v14 = vpop.xlane.xlu2 %322 }
  0x90   :  { %v315_v13 = vpop.xlane.xlu1 %314 }
  0x91   :  { %v410_v42 = vmul.f32 0.0026041667, %v315_v13 }
  0x92   :  { %v307_v52 = vpop.xlane.xlu0 %306 }
  0x93   :  { %v1785_v31 = vsub.f32 %v1564_v16, %v410_v42  ;;  %v1788_v20 = vsub.f32 %v1566_v17, %v410_v42  ;;  %v408_v19 = vmul.f32 0.0026041667, %v307_v52  ;;  %v1791_v34 = vsub.f32 %v1568_v18, %v410_v42 }
  0x95   :  { %2824 = vst [vmem:[#allocation40_spill] sm:$0xff] %v1785_v31  ;;  %v1794_v30 = vsub.f32 %v1573_v27, %v408_v19  ;;  %v1797_v48 = vsub.f32 %v1575_v28, %v408_v19  ;;  %v514_v46 = vmul.f32 %v1785_v31, %v1785_v31  ;;  %v1802_v58 = vsub.f32 %v1577_v32, %v408_v19 }
  0x96   :  { %2825 = vst [vmem:[#allocation41_spill] sm:$0xff] %v1788_v20  ;;  %v327_v16 = vpop.xlane.xlu2 %326  ;;  %v515_v17 = vmul.f32 %v1788_v20, %v1788_v20  ;;  %v516_v28 = vmul.f32 %v1791_v34, %v1791_v34 }
  0x97   :  { %2826 = vst [vmem:[#allocation42_spill] sm:$0xff] %v1791_v34  ;;  %v413_v62 = vmul.f32 0.0026041667, %v327_v16  ;;  %v508_v18 = vmul.f32 %v1794_v30, %v1794_v30  ;;  %v509_v27 = vmul.f32 %v1797_v48, %v1797_v48  ;;  %v412_v16 = vmul.f32 0.0026041667, %v323_v14 }
  0x98   :  { %2827 = vst [vmem:[#allocation43_spill] sm:$0xff] %v1794_v30  ;;  %v319_v55 = vpop.xlane.xlu1 %318  ;;  %v591_v13 = vadd.f32 %v515_v17, %v514_v46 }
  0x99   :  { %2828 = vst [vmem:[#allocation44_spill] sm:$0xff] %v1797_v48  ;;  %v1813_v42 = vsub.f32 %v1582_v38, %v413_v62  ;;  %v1816_v32 = vsub.f32 %v1584_v39, %v413_v62  ;;  %v1819_v52 = vsub.f32 %v1586_v43, %v413_v62  ;;  %v411_v19 = vmul.f32 0.0026041667, %v319_v55 }
  0x9a   :  { %v311_v30 = vpop.xlane.xlu0 %310  ;;  %v592_v20 = vadd.f32 %v591_v13, %v516_v28  ;;  %v510_v48 = vmul.f32 %v1802_v58, %v1802_v58  ;;  %v583_v31 = vadd.f32 %v509_v27, %v508_v18 }
  0x9b   :  { %v1824_v34 = vsub.f32 %v1591_v49, %v411_v19  ;;  %v1827_v38 = vsub.f32 %v1593_v50, %v411_v19  ;;  %v1830_v39 = vsub.f32 %v1595_v54, %v411_v19  ;;  %v409_v46 = vmul.f32 0.0026041667, %v311_v30 }
  0x9c   :  { %593 = vadd.xlane.f32.xlu0 %v592_v20  ;;  %v584_v43 = vadd.f32 %v583_v31, %v510_v48  ;;  %v523_v14 = vmul.f32 %v1813_v42, %v1813_v42  ;;  %v524_v17 = vmul.f32 %v1816_v32, %v1816_v32  ;;  %v525_v62 = vmul.f32 %v1819_v52, %v1819_v52 }
  0x9d   :  { %v1839_v49 = vsub.f32 %v1600_v60, %v409_v46  ;;  %v1842_v50 = vsub.f32 %v1602_v61, %v409_v46  ;;  %v517_v54 = vmul.f32 %v1824_v34, %v1824_v34  ;;  %v1847_v31 = vsub.f32 %v1556_v6, %v412_v16 }
  0x9e   :  { %v1850_v20 = vsub.f32 %v1604_v1, %v409_v46  ;;  %585 = vadd.xlane.f32.xlu1 %v584_v43  ;;  %v339_v30 = vpop.xlane.xlu2 %338  ;;  %v603_v48 = vadd.f32 %v524_v17, %v523_v14  ;;  %v518_v18 = vmul.f32 %v1827_v38, %v1827_v38  ;;  %v1855_v60 = vsub.f32 %v1558_v7, %v412_v16 }
  0x9f   :  { %v416_v61 = vmul.f32 0.0026041667, %v339_v30  ;;  %v511_v27 = vmul.f32 %v1839_v49, %v1839_v49  ;;  %v512_v6 = vmul.f32 %v1842_v50, %v1842_v50  ;;  %v519_v1 = vmul.f32 %v1830_v39, %v1830_v39 }
  0xa0   :  { %v335_v55 = vpop.xlane.xlu1 %334  ;;  %v604_v28 = vadd.f32 %v603_v48, %v525_v62  ;;  %v595_v13 = vadd.f32 %v518_v18, %v517_v54  ;;  %v1873_v43 = vsub.f32 %v1560_v8, %v412_v16  ;;  %v513_v62 = vmul.f32 %v1850_v20, %v1850_v20 }
  0xa1   :  { %v1864_v19 = vsub.f32 %v1609_v10, %v416_v61  ;;  %v1867_v46 = vsub.f32 %v1611_v11, %v416_v61  ;;  %v1870_v7 = vsub.f32 %v1613_v15, %v416_v61  ;;  %v587_v30 = vadd.f32 %v512_v6, %v511_v27 }
  0xa2   :  { %v331_v14 = vpop.xlane.xlu0 %330  ;;  %v596_v17 = vadd.f32 %v595_v13, %v519_v1  ;;  %v415_v48 = vmul.f32 0.0026041667, %v335_v55  ;;  %v520_v10 = vmul.f32 %v1847_v31, %v1847_v31  ;;  %v521_v11 = vmul.f32 %v1855_v60, %v1855_v60 }
  0xa3   :  { %v414_v54 = vmul.f32 0.0026041667, %v331_v14  ;;  %v588_v15 = vadd.f32 %v587_v30, %v513_v62  ;;  %v532_v8 = vmul.f32 %v1864_v19, %v1864_v19  ;;  %v533_v16 = vmul.f32 %v1867_v46, %v1867_v46 }
  0xa4   :  { %605 = vadd.xlane.f32.xlu0 %v604_v28  ;;  %v534_v18 = vmul.f32 %v1870_v7, %v1870_v7  ;;  %v1897_v1 = vsub.f32 %v1618_v24, %v415_v48  ;;  %v1900_v13 = vsub.f32 %v1620_v25, %v415_v48  ;;  %v599_v62 = vadd.f32 %v521_v11, %v520_v10 }
  0xa5   :  { %v1888_v61 = vsub.f32 %v1626_v37, %v414_v54  ;;  %v1891_v27 = vsub.f32 %v1628_v40, %v414_v54  ;;  %v1894_v6 = vsub.f32 %v1630_v45, %v414_v54  ;;  %589 = vadd.xlane.f32.xlu2 %v588_v15  ;;  %v615_v55 = vadd.f32 %v533_v16, %v532_v8 }
  0xa6   :  { %597 = vadd.xlane.f32.xlu1 %v596_v17  ;;  %v347_v28 = vpop.xlane.xlu2 %346  ;;  %v522_v17 = vmul.f32 %v1873_v43, %v1873_v43  ;;  %v529_v15 = vmul.f32 %v1897_v1, %v1897_v1  ;;  %v530_v8 = vmul.f32 %v1900_v13, %v1900_v13 }
  0xa7   :  { %2829 = vst [vmem:[#allocation45_spill] sm:$0xff] %v1891_v27  ;;  %v526_v37 = vmul.f32 %v1888_v61, %v1888_v61  ;;  %v527_v40 = vmul.f32 %v1891_v27, %v1891_v27  ;;  %v616_v45 = vadd.f32 %v615_v55, %v534_v18  ;;  %v528_v24 = vmul.f32 %v1894_v6, %v1894_v6 }
  0xa8   :  { %v1906_v14 = vpop.xlane.xlu1 %406  ;;  %v600_v16 = vadd.f32 %v599_v62, %v522_v17  ;;  %v418_v18 = vmul.f32 0.0026041667, %v347_v28  ;;  %v1917_v55 = vsub.f32 %v1622_v35, %v415_v48 }
  0xa9   :  { %v607_v30 = vadd.f32 %v527_v40, %v526_v37 }
  0xaa   :  { %v343_v54 = vpop.xlane.xlu0 %342  ;;  %v1933_v48 = vsub.f32 %v1651_v22, %v418_v18  ;;  %v1941_v62 = vsub.f32 %v1655_v26, %v418_v18 }
  0xab   :  { %v417_v25 = vmul.f32 0.0026041667, %v343_v54  ;;  %v608_v27 = vadd.f32 %v607_v30, %v528_v24  ;;  %v611_v54 = vadd.f32 %v530_v8, %v529_v15 }
  0xac   :  { %617 = vadd.xlane.f32.xlu0 %v616_v45  ;;  %2833 = vst [vmem:[#allocation49_spill] sm:$0xff] %v1933_v48  ;;  %v538_v26 = vmul.f32 %v1933_v48, %v1933_v48 }
  0xad   :  { %v1920_v10 = vsub.f32 %v1647_v12, %v417_v25  ;;  %v1923_v11 = vsub.f32 %v1649_v21, %v417_v25  ;;  %v1926_v37 = vsub.f32 %v1661_v51, %v417_v25  ;;  %601 = vadd.xlane.f32.xlu2 %v600_v16  ;;  %v1936_v12 = vsub.f32 %v1653_v23, %v418_v18  ;;  %v2837_v25 = vld [vmem:[#allocation18_spill] sm:$0xff]  ;;  %v2839_v16 = vld [vmem:[#allocation24_spill] sm:$0xff] }
  0xae   :  { %609 = vadd.xlane.f32.xlu1 %v608_v27  ;;  %v359_v40 = vpop.xlane.xlu2 %358  ;;  %v531_v51 = vmul.f32 %v1917_v55, %v1917_v55  ;;  %2835 = vst [vmem:[#allocation51_spill] sm:$0xff] %v1941_v62 }
  0xaf   :  { %2830 = vst [vmem:[#allocation46_spill] sm:$0xff] %v1920_v10  ;;  %v535_v45 = vmul.f32 %v1920_v10, %v1920_v10  ;;  %v536_v35 = vmul.f32 %v1923_v11, %v1923_v11  ;;  %v421_v17 = vmul.f32 0.0026041667, %v359_v40  ;;  %v537_v24 = vmul.f32 %v1926_v37, %v1926_v37  ;;  %v2841_v40 = vld [vmem:[#allocation21_spill] sm:$0xff] }
  0xb0   :  { %2831 = vst [vmem:[#allocation47_spill] sm:$0xff] %v1923_v11  ;;  %v355_v21 = vpop.xlane.xlu1 %354  ;;  %v612_v8 = vadd.f32 %v611_v54, %v531_v51  ;;  %v539_v18 = vmul.f32 %v1936_v12, %v1936_v12 }
  0xb1   :  { %2832 = vst [vmem:[#allocation48_spill] sm:$0xff] %v1926_v37  ;;  %v420_v28 = vmul.f32 0.0026041667, %v355_v21  ;;  %v619_v27 = vadd.f32 %v536_v35, %v535_v45 }
  0xb2   :  { %2834 = vst [vmem:[#allocation50_spill] sm:$0xff] %v1936_v12  ;;  %v351_v30 = vpop.xlane.xlu0 %350 }
  0xb3   :  { %v1946_v22 = vsub.f32 %v1666_v4, %v420_v28  ;;  %v1949_v23 = vsub.f32 %v2837_v25, %v420_v28  ;;  %v419_v15 = vmul.f32 0.0026041667, %v351_v30  ;;  %v1952_v21 = vsub.f32 %v2839_v16, %v420_v28  ;;  %v2843_v4 = vld [vmem:[#allocation22_spill] sm:$0xff]  ;;  %v2845_v25 = vld [vmem:[#allocation19_spill] sm:$0xff]  ;;  %v2847_v28 = vld [vmem:[#allocation25_spill] sm:$0xff] }
  0xb4   :  { %v620_v45 = vadd.f32 %v619_v27, %v537_v24  ;;  %v1965_v11 = vsub.f32 %v2845_v25, %v421_v17  ;;  %v2849_v27 = vld [vmem:[#allocation20_spill] sm:$0xff] }
  0xb5   :  { %2836 = vst [vmem:[#allocation52_spill] sm:$0xff] %v1946_v22  ;;  %v1959_v35 = vsub.f32 %v2841_v40, %v419_v15  ;;  %v1962_v37 = vsub.f32 %v2843_v4, %v419_v15  ;;  %v544_v54 = vmul.f32 %v1946_v22, %v1946_v22  ;;  %v1970_v51 = vsub.f32 %v2847_v28, %v419_v15 }
  0xb6   :  { %2838 = vst [vmem:[#allocation18_spill] sm:$0xff] %v1949_v23  ;;  %613 = vadd.xlane.f32.xlu2 %v612_v8  ;;  %621 = vadd.xlane.f32.xlu1 %v620_v45  ;;  %v1973_v30 = vsub.f32 %v2849_v27, %v421_v17  ;;  %v545_v24 = vmul.f32 %v1949_v23, %v1949_v23  ;;  %v371_v16 = vpop.xlane.xlu2 %370  ;;  %v2851_v27 = vld [vmem:[#allocation23_spill] sm:$0xff] }
  0xb7   :  { %2840 = vst [vmem:[#allocation24_spill] sm:$0xff] %v1952_v21  ;;  %v541_v40 = vmul.f32 %v1959_v35, %v1959_v35  ;;  %v542_v4 = vmul.f32 %v1962_v37, %v1962_v37  ;;  %v540_v15 = vmul.f32 %v1941_v62, %v1941_v62  ;;  %v623_v28 = vadd.f32 %v539_v18, %v538_v26  ;;  %v2853_v18 = vld [vmem:[#allocation28_spill] sm:$0xff] }
  0xb8   :  { %2842 = vst [vmem:[#allocation21_spill] sm:$0xff] %v1959_v35  ;;  %v367_v25 = vpop.xlane.xlu1 %366  ;;  %v546_v8 = vmul.f32 %v1952_v21, %v1952_v21  ;;  %v631_v45 = vadd.f32 %v545_v24, %v544_v54  ;;  %v1986_v22 = vsub.f32 %v2851_v27, %v421_v17  ;;  %v543_v35 = vmul.f32 %v1970_v51, %v1970_v51  ;;  %v2855_v54 = vld [vmem:[#allocation29_spill] sm:$0xff]  ;;  %v2859_v27 = vld [vmem:[#allocation30_spill] sm:$0xff] }
  0xb9   :  { %2844 = vst [vmem:[#allocation22_spill] sm:$0xff] %v1962_v37  ;;  %v423_v23 = vmul.f32 0.0026041667, %v367_v25  ;;  %v627_v12 = vadd.f32 %v542_v4, %v541_v40  ;;  %v547_v37 = vmul.f32 %v1965_v11, %v1965_v11  ;;  %v548_v26 = vmul.f32 %v1973_v30, %v1973_v30 }
  0xba   :  { %2846 = vst [vmem:[#allocation19_spill] sm:$0xff] %v1965_v11  ;;  %v363_v48 = vpop.xlane.xlu0 %362  ;;  %v632_v10 = vadd.f32 %v631_v45, %v546_v8  ;;  %v624_v4 = vadd.f32 %v623_v28, %v540_v15  ;;  %v424_v8 = vmul.f32 0.0026041667, %v371_v16  ;;  %v2862_v16 = vld [vmem:[#allocation26_spill] sm:$0xff]  ;;  %v2863_v28 = vld [vmem:[#allocation27_spill] sm:$0xff] }
  0xbb   :  { %2848 = vst [vmem:[#allocation25_spill] sm:$0xff] %v1970_v51  ;;  %v1995_v62 = vsub.f32 %v2853_v18, %v423_v23  ;;  %v1998_v24 = vsub.f32 %v2855_v54, %v423_v23  ;;  %v422_v17 = vmul.f32 0.0026041667, %v363_v48  ;;  %v2001_v40 = vsub.f32 %v1710_v56, %v423_v23  ;;  %v2868_v51 = vld [vmem:[#allocation36_spill] sm:$0xff] }
  0xbc   :  { %2850 = vst [vmem:[#allocation20_spill] sm:$0xff] %v1973_v30  ;;  %v628_v25 = vadd.f32 %v627_v12, %v543_v35  ;;  %v549_v18 = vmul.f32 %v1986_v22, %v1986_v22  ;;  %v2861_v30 = vld [vmem:[#allocation32_spill] sm:$0xff]  ;;  %v635_v56 = vadd.f32 %v548_v26, %v547_v37  ;;  %v2023_v15 = vsub.f32 %v2862_v16, %v424_v8 }
  0xbd   :  { %2852 = vst [vmem:[#allocation23_spill] sm:$0xff] %v1986_v22  ;;  %v2004_v45 = vsub.f32 %v1702_v47, %v422_v17  ;;  %v2007_v11 = vsub.f32 %v2859_v27, %v422_v17  ;;  %v553_v54 = vmul.f32 %v1995_v62, %v1995_v62  ;;  %v2014_v48 = vsub.f32 %v2861_v30, %v422_v17  ;;  %v2866_v22 = vld [vmem:[#allocation35_spill] sm:$0xff] }
  0xbe   :  { %2854 = vst [vmem:[#allocation28_spill] sm:$0xff] %v1995_v62  ;;  %625 = vadd.xlane.f32.xlu2 %v624_v4  ;;  %633 = vadd.xlane.f32.xlu1 %v632_v10  ;;  %v554_v12 = vmul.f32 %v1998_v24, %v1998_v24  ;;  %v383_v35 = vpop.xlane.xlu2 %382  ;;  %v2026_v30 = vsub.f32 %v2863_v28, %v424_v8  ;;  %v2865_v62 = vld [vmem:[#allocation31_spill] sm:$0xff] }
  0xbf   :  { %2856 = vst [vmem:[#allocation29_spill] sm:$0xff] %v1998_v24  ;;  %629 = vadd.xlane.f32.xlu0 %v628_v25  ;;  %v550_v47 = vmul.f32 %v2004_v45, %v2004_v45  ;;  %v551_v23 = vmul.f32 %v2007_v11, %v2007_v11  ;;  %v555_v10 = vmul.f32 %v2001_v40, %v2001_v40  ;;  %v427_v24 = vmul.f32 0.0026041667, %v383_v35 }
  0xc0   :  { %2857 = vst [vmem:[#allocation53_spill] sm:$0xff] %v2001_v40  ;;  %v379_v17 = vpop.xlane.xlu1 %378  ;;  %v643_v37 = vadd.f32 %v554_v12, %v553_v54  ;;  %v636_v27 = vadd.f32 %v635_v56, %v549_v18  ;;  %v2033_v16 = vsub.f32 %v2865_v62, %v424_v8  ;;  %v556_v18 = vmul.f32 %v2023_v15, %v2023_v15  ;;  %v2870_v8 = vld [vmem:[#allocation37_spill] sm:$0xff] }
  0xc1   :  { %2858 = vst [vmem:[#allocation54_spill] sm:$0xff] %v2004_v45  ;;  %v426_v26 = vmul.f32 0.0026041667, %v379_v17  ;;  %v639_v4 = vadd.f32 %v551_v23, %v550_v47  ;;  %v557_v56 = vmul.f32 %v2026_v30, %v2026_v30  ;;  %v432_v62 = vmul.f32 0.0026041667, %v1906_v14  ;;  %v2875_v17 = vld [vmem:[#allocation34_spill] sm:$0xff] }
  0xc2   :  { %2860 = vst [vmem:[#allocation30_spill] sm:$0xff] %v2007_v11  ;;  %v375_v25 = vpop.xlane.xlu0 %374  ;;  %v644_v45 = vadd.f32 %v643_v37, %v555_v10  ;;  %v552_v11 = vmul.f32 %v2014_v48, %v2014_v48  ;;  %v2066_v10 = vsub.f32 %v2875_v17, %v427_v24 }
  0xc3   :  { %2864 = vst [vmem:[#allocation32_spill] sm:$0xff] %v2026_v30  ;;  %v2036_v28 = vsub.f32 %v2866_v22, %v426_v26  ;;  %v2039_v21 = vsub.f32 %v2868_v51, %v426_v26  ;;  %v425_v40 = vmul.f32 0.0026041667, %v375_v25  ;;  %v2042_v54 = vsub.f32 %v1737_v53, %v426_v26  ;;  %v2872_v22 = vld [vmem:[#allocation38_spill] sm:$0xff] }
  0xc4   :  { %v640_v12 = vadd.f32 %v639_v4, %v552_v11  ;;  %v2874_v11 = vld [vmem:[#allocation33_spill] sm:$0xff] }
  0xc5   :  { %2867 = vst [vmem:[#allocation26_spill] sm:$0xff] %v2036_v28  ;;  %v2050_v47 = vsub.f32 %v2870_v8, %v425_v40  ;;  %v2053_v23 = vsub.f32 %v2872_v22, %v425_v40  ;;  %v562_v51 = vmul.f32 %v2036_v28, %v2036_v28  ;;  %v2058_v53 = vsub.f32 %v1741_v29, %v425_v40  ;;  %v2878_v8 = vld [vmem:[#allocation16_spill] sm:$0xff] }
  0xc6   :  { %2869 = vst [vmem:[#allocation27_spill] sm:$0xff] %v2039_v21  ;;  %637 = vadd.xlane.f32.xlu2 %v636_v27  ;;  %645 = vadd.xlane.f32.xlu1 %v644_v45  ;;  %v2061_v35 = vsub.f32 %v2874_v11, %v427_v24  ;;  %v563_v14 = vmul.f32 %v2039_v21, %v2039_v21  ;;  %v2876_v27 = vld [vmem:[#allocation15_spill] sm:$0xff] }
  0xc7   :  { %2871 = vst [vmem:[#allocation31_spill] sm:$0xff] %v2050_v47  ;;  %641 = vadd.xlane.f32.xlu0 %v640_v12  ;;  %v559_v37 = vmul.f32 %v2050_v47, %v2050_v47  ;;  %v560_v26 = vmul.f32 %v2053_v23, %v2053_v23  ;;  %v558_v40 = vmul.f32 %v2033_v16, %v2033_v16  ;;  %v395_v47 = vpop.xlane.xlu2 %394  ;;  %v2880_v21 = vld [vmem:[#allocation39_spill] sm:$0xff] }
  0xc8   :  { %2873 = vst [vmem:[#allocation35_spill] sm:$0xff] %v2053_v23  ;;  %v391_v29 = vpop.xlane.xlu1 %390  ;;  %v647_v45 = vadd.f32 %v557_v56, %v556_v18  ;;  %v564_v4 = vmul.f32 %v2042_v54, %v2042_v54  ;;  %v655_v25 = vadd.f32 %v563_v14, %v562_v51  ;;  %v2077_v12 = vsub.f32 %v2876_v27, %v432_v62 }
  0xc9   :  { %v2080_v22 = vsub.f32 %v2878_v8, %v432_v62  ;;  %v429_v11 = vmul.f32 0.0026041667, %v391_v29  ;;  %v651_v17 = vadd.f32 %v560_v26, %v559_v37  ;;  %v2083_v23 = vsub.f32 %v2880_v21, %v427_v24 }
  0xca   :  { %2877 = vst [vmem:[#allocation36_spill] sm:$0xff] %v2077_v12  ;;  %v387_v28 = vpop.xlane.xlu0 %386  ;;  %v656_v30 = vadd.f32 %v655_v25, %v564_v4  ;;  %v561_v18 = vmul.f32 %v2058_v53, %v2058_v53  ;;  %v565_v56 = vmul.f32 %v2061_v35, %v2061_v35  ;;  %v566_v37 = vmul.f32 %v2066_v10, %v2066_v10 }
  0xcb   :  { %2879 = vst [vmem:[#allocation37_spill] sm:$0xff] %v2080_v22  ;;  %v2090_v51 = vsub.f32 %v1751_v3, %v429_v11  ;;  %v2093_v14 = vsub.f32 %v1753_v44, %v429_v11  ;;  %v428_v29 = vmul.f32 0.0026041667, %v387_v28  ;;  %v2098_v21 = vsub.f32 %v1764_v2, %v429_v11 }
  0xcc   :  { %v648_v24 = vadd.f32 %v647_v45, %v558_v40  ;;  %v652_v26 = vadd.f32 %v651_v17, %v561_v18  ;;  %v430_v4 = vmul.f32 0.0026041667, %v395_v47  ;;  %v580_v28 = vmul.f32 %v2077_v12, %v2077_v12 }
  0xcd   :  { %2881 = vst [vmem:[#allocation38_spill] sm:$0xff] %v2090_v51  ;;  %v2101_v25 = vsub.f32 %v1756_v41, %v428_v29  ;;  %v2104_v27 = vsub.f32 %v1758_v59, %v428_v29  ;;  %v2107_v3 = vsub.f32 %v1768_v9, %v428_v29  ;;  %v571_v44 = vmul.f32 %v2090_v51, %v2090_v51 }
  0xce   :  { %2882 = vst [vmem:[#allocation33_spill] sm:$0xff] %v2093_v14  ;;  %649 = vadd.xlane.f32.xlu2 %v648_v24  ;;  %657 = vadd.xlane.f32.xlu1 %v656_v30  ;;  %v572_v2 = vmul.f32 %v2093_v14, %v2093_v14  ;;  %v567_v41 = vmul.f32 %v2083_v23, %v2083_v23 }
  0xcf   :  { %2883 = vst [vmem:[#allocation34_spill] sm:$0xff] %v2098_v21  ;;  %653 = vadd.xlane.f32.xlu0 %v652_v26  ;;  %v659_v59 = vadd.f32 %v566_v37, %v565_v56  ;;  %v568_v9 = vmul.f32 %v2101_v25, %v2101_v25  ;;  %v569_v47 = vmul.f32 %v2104_v27, %v2104_v27  ;;  %v2889_v37 = vld [vmem:[#allocation17_spill] sm:$0xff] }
  0xd0   :  { %2884 = vst [vmem:[#allocation15_spill] sm:$0xff] %v2101_v25  ;;  %v2122_v40 = vsub.f32 %v1746_v5, %v430_v4  ;;  %v2125_v30 = vsub.f32 %v1748_v36, %v430_v4  ;;  %v573_v45 = vmul.f32 %v2098_v21, %v2098_v21  ;;  %v667_v8 = vadd.f32 %v572_v2, %v571_v44  ;;  %v2899_v21 = vld [vmem:[#allocation44_spill] sm:$0xff] }
  0xd1   :  { %2885 = vst [vmem:[#allocation16_spill] sm:$0xff] %v2104_v27  ;;  %v570_v11 = vmul.f32 %v2107_v3, %v2107_v3  ;;  %v663_v17 = vadd.f32 %v569_v47, %v568_v9  ;;  %v581_v18 = vmul.f32 %v2080_v22, %v2080_v22  ;;  %v2134_v24 = vsub.f32 %v2889_v37, %v432_v62 }
  0xd2   :  { %2886 = vst [vmem:[#allocation39_spill] sm:$0xff] %v2107_v3  ;;  %v399_v56 = vpop.xlane.xlu0 %398  ;;  %v668_v29 = vadd.f32 %v667_v8, %v573_v45  ;;  %v679_v36 = vsel %vm400_vm0, %v580_v28, 0.0  ;;  %v2138_v12 = vsub.f32 %v1760_v0, %v430_v4  ;;  %v660_v44 = vadd.f32 %v659_v59, %v567_v41 }
  0xd3   :  { %2887 = vst [vmem:[#allocation55_spill] sm:$0xff] %v2122_v40  ;;  %v431_v5 = vmul.f32 0.0026041667, %v399_v56  ;;  %v664_v26 = vadd.f32 %v663_v17, %v570_v11  ;;  %v574_v2 = vmul.f32 %v2122_v40, %v2122_v40  ;;  %v575_v9 = vmul.f32 %v2125_v30, %v2125_v30 }
  0xd4   :  { %2888 = vst [vmem:[#allocation56_spill] sm:$0xff] %v2125_v30  ;;  %v680_v28 = vsel %vm400_vm0, %v581_v18, 0.0  ;;  %v582_v0 = vmul.f32 %v2134_v24, %v2134_v24 }
  0xd5   :  { %2890 = vst [vmem:[#allocation17_spill] sm:$0xff] %v2134_v24  ;;  %v2145_v47 = vsub.f32 %v1775_v63, %v431_v5  ;;  %v2148_v62 = vsub.f32 %v1777_v33, %v431_v5  ;;  %v2151_v45 = vsub.f32 %v1779_v57, %v431_v5  ;;  %v576_v33 = vmul.f32 %v2138_v12, %v2138_v12 }
  0xd6   :  { %2891 = vst [vmem:[#allocation57_spill] sm:$0xff] %v2138_v12  ;;  %661 = vadd.xlane.f32.xlu2 %v660_v44  ;;  %669 = vadd.xlane.f32.xlu1 %v668_v29  ;;  %v671_v41 = vadd.f32 %v575_v9, %v574_v2  ;;  %v681_v57 = vadd.f32 %v680_v28, %v679_v36  ;;  %v682_v11 = vsel %vm400_vm0, %v582_v0, 0.0 }
  0xd7   :  { %2892 = vst [vmem:[#allocation58_spill] sm:$0xff] %v2145_v47  ;;  %665 = vadd.xlane.f32.xlu0 %v664_v26  ;;  %v577_v4 = vmul.f32 %v2145_v47, %v2145_v47  ;;  %v578_v63 = vmul.f32 %v2148_v62, %v2148_v62  ;;  %v579_v59 = vmul.f32 %v2151_v45, %v2151_v45 }
  0xd8   :  { %2893 = vst [vmem:[#allocation59_spill] sm:$0xff] %v2148_v62  ;;  %v672_v18 = vadd.f32 %v671_v41, %v576_v33  ;;  %v683_v56 = vadd.f32 %v682_v11, %v681_v57 }
  0xd9   :  { %2894 = vst [vmem:[#allocation60_spill] sm:$0xff] %v2151_v45  ;;  %v675_v8 = vadd.f32 %v578_v63, %v577_v4 }
  0xdb   :  { %v676_v17 = vadd.f32 %v675_v8, %v579_v59  ;;  %v77_v59 = vld [vmem:[#allocation7] sm:$0x7] }
  0xde   :  { %673 = vadd.xlane.f32.xlu2 %v672_v18  ;;  %684 = vadd.xlane.f32.xlu1 %v683_v56 }
  0xdf   :  { %677 = vadd.xlane.f32.xlu0 %v676_v17  ;;  %v78_v17 = vld [vmem:[#allocation8] sm:$0x7] }
  0xe0   :  { %v2190_v30 = vperm.slane %v78_v17, 2 }
 0x10f   :  { %v594_v29 = vpop.xlane.xlu0 %593 }
 0x110   :  { %v688_v37 = vmul.f32 0.0026041667, %v594_v29 }
 0x111   :  { %v586_v5 = vpop.xlane.xlu1 %585 }
 0x112   :  { %v686_v26 = vmul.f32 0.0026041667, %v586_v5  ;;  %v713_v44 = vadd.f32 1e-05, %v688_v37  ;;  %v2173_v37 = vperm.slane %v77_v59, 0 }
 0x114   :  { %v711_v62 = vadd.f32 1e-05, %v686_v26  ;;  %1328 = vrsqrt.f32 %v713_v44  ;;  %vm762_vm2 = vweird.f32 %v713_v44 }
 0x116   :  { %1330 = vrsqrt.f32 %v711_v62  ;;  %vm742_vm4 = vweird.f32 %v711_v62 }
 0x117   :  { %v606_v36 = vpop.xlane.xlu0 %605 }
 0x118   :  { %v691_v2 = vmul.f32 0.0026041667, %v606_v36  ;;  %v590_v28 = vpop.xlane.xlu2 %589  ;;  %v2176_v36 = vperm.slane %v77_v59, 1 }
 0x119   :  { %v598_v9 = vpop.xlane.xlu1 %597  ;;  %v687_v63 = vmul.f32 0.0026041667, %v590_v28 }
 0x11a   :  { %v1329_v4 = vpop.eup %1328  ;;  %v689_v0 = vmul.f32 0.0026041667, %v598_v9  ;;  %v2165_v33 = vadd.f32 1e-05, %v691_v2  ;;  %v2178_v2 = vperm.slane %v77_v59, 2  ;;  %v2180_v9 = vperm.slane %v78_v17, 0 }
 0x11b   :  { %v757_v41 = vmul.f32 %v1329_v4, %v713_v44  ;;  %v2169_v11 = vadd.f32 1e-05, %v687_v63  ;;  %v2182_v63 = vperm.slane %v78_v17, 1  ;;  %vm763_vm1 = vweird.f32 %v1329_v4 }
 0x11c   :  { %v1331_v57 = vpop.eup %1330  ;;  %v2167_v8 = vadd.f32 1e-05, %v689_v0  ;;  %1332 = vrsqrt.f32 %v2165_v33  ;;  %vm764_vm5 = vmor %vm762_vm2, %vm763_vm1  ;;  %vm792_vm9 = vweird.f32 %v2165_v33 }
 0x11d   :  { %v737_v18 = vmul.f32 %v1331_v57, %v711_v62  ;;  %v758_v56 = vmul.f32 %v1329_v4, %v757_v41  ;;  %vm743_vm3 = vweird.f32 %v1331_v57  ;;  %v2895_v62 = vld [vmem:[#allocation40_spill] sm:$0xff]  ;;  %vm752_vm12 = vweird.f32 %v2169_v11 }
 0x11e   :  { %1334 = vrsqrt.f32 %v2167_v8  ;;  %vm772_vm6 = vweird.f32 %v2167_v8  ;;  %vm744_vm7 = vmor %vm742_vm4, %vm743_vm3 }
 0x11f   :  { %v738_v29 = vmul.f32 %v1331_v57, %v737_v18  ;;  %v759_v5 = vmul.f32 0.5, %v758_v56  ;;  %1336 = vrsqrt.f32 %v2169_v11  ;;  %v618_v26 = vpop.xlane.xlu0 %617 }
 0x120   :  { %v694_v28 = vmul.f32 0.0026041667, %v618_v26  ;;  %v602_v45 = vpop.xlane.xlu2 %601 }
 0x121   :  { %v739_v0 = vmul.f32 0.5, %v738_v29  ;;  %v760_v41 = vsub.f32 1.5, %v759_v5  ;;  %v610_v18 = vpop.xlane.xlu1 %609  ;;  %v690_v56 = vmul.f32 0.0026041667, %v602_v45 }
 0x122   :  { %v2184_v47 = vpop.eup %1332  ;;  %v692_v24 = vmul.f32 0.0026041667, %v610_v18  ;;  %v2186_v22 = vadd.f32 1e-05, %v694_v28 }
 0x123   :  { %v740_v12 = vsub.f32 1.5, %v739_v0  ;;  %v761_v59 = vmul.f32 %v1329_v4, %v760_v41  ;;  %v787_v26 = vmul.f32 %v2184_v47, %v2165_v33  ;;  %v2193_v5 = vadd.f32 1e-05, %v690_v56  ;;  %v2896_v41 = vld [vmem:[#allocation41_spill] sm:$0xff]  ;;  %v2897_v56 = vld [vmem:[#allocation42_spill] sm:$0xff] }
 0x124   :  { %v1335_v29 = vpop.eup %1334  ;;  %v2195_v40 = vadd.f32 1e-05, %v692_v24  ;;  %1338 = vrsqrt.f32 %v2186_v22  ;;  %vm793_vm13 = vweird.f32 %v2184_v47  ;;  %vm822_vm15 = vweird.f32 %v2186_v22 }
 0x125   :  { %v2197_v45 = vpop.eup %1336  ;;  %v741_v44 = vmul.f32 %v1331_v57, %v740_v12  ;;  %v765_v28 = vsel %vm764_vm5, %v1329_v4, %v761_v59  ;;  %v767_v0 = vmul.f32 %v1335_v29, %v2167_v8  ;;  %vm773_vm8 = vweird.f32 %v1335_v29  ;;  %v2898_v59 = vld [vmem:[#allocation43_spill] sm:$0xff]  ;;  %vm794_vm0 = vmor %vm792_vm9, %vm793_vm13 }
 0x126   :  { %v992_v17 = vmul.f32 %v765_v28, %v2895_v62  ;;  %v993_v18 = vmul.f32 %v765_v28, %v2896_v41  ;;  %v994_v3 = vmul.f32 %v765_v28, %v2897_v56  ;;  %v747_v24 = vmul.f32 %v2197_v45, %v2169_v11  ;;  %vm774_vm11 = vmor %vm772_vm6, %vm773_vm8 }
 0x127   :  { %v745_v27 = vsel %vm744_vm7, %v1331_v57, %v741_v44  ;;  %v768_v12 = vmul.f32 %v1335_v29, %v767_v0  ;;  %v788_v4 = vmul.f32 %v2184_v47, %v787_v26  ;;  %vm753_vm10 = vweird.f32 %v2197_v45 }
 0x128   :  { %v986_v25 = vmul.f32 %v745_v27, %v2898_v59  ;;  %v987_v14 = vmul.f32 %v745_v27, %v2899_v21  ;;  %v988_v62 = vmul.f32 %v745_v27, %v1802_v58  ;;  %v1074_v41 = vmul.f32 %v2173_v37, %v992_v17  ;;  %vm754_vm14 = vmor %vm752_vm12, %vm753_vm10 }
 0x129   :  { %v1075_v28 = vmul.f32 %v2176_v36, %v993_v18  ;;  %v1076_v56 = vmul.f32 %v2178_v2, %v994_v3  ;;  %v769_v51 = vmul.f32 0.5, %v768_v12  ;;  %v748_v57 = vmul.f32 %v2197_v45, %v747_v24  ;;  %v614_v24 = vpop.xlane.xlu2 %613 }
 0x12a   :  { %v1068_v44 = vmul.f32 %v2173_v37, %v986_v25  ;;  %v1069_v26 = vmul.f32 %v2176_v36, %v987_v14  ;;  %v1070_v0 = vmul.f32 %v2178_v2, %v988_v62  ;;  %v1156_v59 = vadd.f32 %v2180_v9, %v1074_v41  ;;  %v2221_v21 = vpop.eup %1338 }
 0x12b   :  { %v1157_v58 = vadd.f32 %v2182_v63, %v1075_v28  ;;  %v770_v27 = vsub.f32 1.5, %v769_v51  ;;  %v749_v17 = vmul.f32 0.5, %v748_v57  ;;  %v789_v14 = vmul.f32 0.5, %v788_v4 }
 0x12c   :  { %v1150_v3 = vadd.f32 %v2180_v9, %v1068_v44  ;;  %v1151_v18 = vadd.f32 %v2182_v63, %v1069_v26  ;;  %v1152_v25 = vadd.f32 %v2190_v30, %v1070_v0  ;;  %1231 = vst [vmem:[#allocation10 + $0x30] sm:$0xff] %v1156_v59  ;;  %v1158_v12 = vadd.f32 %v2190_v30, %v1076_v56  ;;  %v622_v44 = vpop.xlane.xlu1 %621 }
 0x12d   :  { %1232 = vst [vmem:[#allocation10 + $0x38] sm:$0xff] %v1157_v58  ;;  %v771_v62 = vmul.f32 %v1335_v29, %v770_v27  ;;  %v750_v41 = vsub.f32 1.5, %v749_v17  ;;  %1340 = vrsqrt.f32 %v2193_v5  ;;  %v790_v51 = vsub.f32 1.5, %v789_v14 }
 0x12e   :  { %1225 = vst [vmem:[#allocation10] sm:$0xff] %v1150_v3  ;;  %v817_v4 = vmul.f32 %v2221_v21, %v2186_v22  ;;  %1342 = vrsqrt.f32 %v2195_v40  ;;  %v693_v57 = vmul.f32 0.0026041667, %v614_v24  ;;  %vm823_vm1 = vweird.f32 %v2221_v21 }
 0x12f   :  { %1226 = vst [vmem:[#allocation10 + $0x8] sm:$0xff] %v1151_v18  ;;  %v775_v28 = vsel %vm774_vm11, %v1335_v29, %v771_v62  ;;  %v751_v56 = vmul.f32 %v2197_v45, %v750_v41  ;;  %v791_v0 = vmul.f32 %v2184_v47, %v790_v51  ;;  %vm782_vm2 = vweird.f32 %v2193_v5  ;;  %vm824_vm4 = vmor %vm822_vm15, %vm823_vm1 }
 0x130   :  { %1227 = vst [vmem:[#allocation10 + $0x10] sm:$0xff] %v1152_v25  ;;  %v995_v8 = vmul.f32 %v775_v28, %v1824_v34  ;;  %v996_v26 = vmul.f32 %v775_v28, %v1827_v38  ;;  %v997_v11 = vmul.f32 %v775_v28, %v1830_v39  ;;  %v818_v59 = vmul.f32 %v2221_v21, %v817_v4 }
 0x131   :  { %1233 = vst [vmem:[#allocation10 + $0x40] sm:$0xff] %v1158_v12  ;;  %v755_v29 = vsel %vm754_vm14, %v2197_v45, %v751_v56  ;;  %v2248_v58 = vadd.f32 1e-05, %v693_v57  ;;  %v795_v18 = vsel %vm794_vm0, %v2184_v47, %v791_v0  ;;  %v695_v28 = vmul.f32 0.0026041667, %v622_v44  ;;  %v626_v44 = vpop.xlane.xlu2 %625 }
 0x132   :  { %v1077_v34 = vmul.f32 %v2173_v37, %v995_v8  ;;  %v1078_v38 = vmul.f32 %v2176_v36, %v996_v26  ;;  %v1079_v39 = vmul.f32 %v2178_v2, %v997_v11  ;;  %v989_v27 = vmul.f32 %v755_v29, %v1839_v49 }
 0x133   :  { %v2258_v45 = vpop.eup %1340  ;;  %v990_v17 = vmul.f32 %v755_v29, %v1842_v50  ;;  %v991_v3 = vmul.f32 %v755_v29, %v1850_v20  ;;  %v819_v25 = vmul.f32 0.5, %v818_v59  ;;  %v1001_v50 = vmul.f32 %v795_v18, %v1813_v42 }
 0x134   :  { %v1159_v14 = vadd.f32 %v2180_v9, %v1077_v34  ;;  %v1160_v24 = vadd.f32 %v2182_v63, %v1078_v38  ;;  %v1161_v49 = vadd.f32 %v2190_v30, %v1079_v39  ;;  %v1071_v12 = vmul.f32 %v2173_v37, %v989_v27  ;;  %v2267_v62 = vpop.eup %1342  ;;  %v634_v59 = vpop.xlane.xlu1 %633 }
 0x135   :  { %v1072_v33 = vmul.f32 %v2176_v36, %v990_v17  ;;  %v1073_v41 = vmul.f32 %v2178_v2, %v991_v3  ;;  %v1002_v20 = vmul.f32 %v795_v18, %v1816_v32  ;;  %v1003_v51 = vmul.f32 %v795_v18, %v1819_v52 }
 0x136   :  { %1234 = vst [vmem:[#allocation10 + $0x48] sm:$0xff] %v1159_v14  ;;  %v1153_v47 = vadd.f32 %v2180_v9, %v1071_v12  ;;  %v777_v4 = vmul.f32 %v2258_v45, %v2193_v5  ;;  %v1083_v8 = vmul.f32 %v2173_v37, %v1001_v50  ;;  %v797_v52 = vmul.f32 %v2267_v62, %v2195_v40 }
 0x137   :  { %1235 = vst [vmem:[#allocation10 + $0x50] sm:$0xff] %v1160_v24  ;;  %v1154_v56 = vadd.f32 %v2182_v63, %v1072_v33  ;;  %v1155_v57 = vadd.f32 %v2190_v30, %v1073_v41  ;;  %v1084_v42 = vmul.f32 %v2176_v36, %v1002_v20  ;;  %v1085_v32 = vmul.f32 %v2178_v2, %v1003_v51 }
 0x138   :  { %1236 = vst [vmem:[#allocation10 + $0x58] sm:$0xff] %v1161_v49  ;;  %v778_v26 = vmul.f32 %v2258_v45, %v777_v4  ;;  %v1165_v11 = vadd.f32 %v2180_v9, %v1083_v8  ;;  %v820_v29 = vsub.f32 1.5, %v819_v25  ;;  %1344 = vrsqrt.f32 %v2248_v58 }
 0x139   :  { %1228 = vst [vmem:[#allocation10 + $0x18] sm:$0xff] %v1153_v47  ;;  %v1166_v0 = vadd.f32 %v2182_v63, %v1084_v42  ;;  %v1167_v34 = vadd.f32 %v2190_v30, %v1085_v32  ;;  %v798_v39 = vmul.f32 %v2267_v62, %v797_v52  ;;  %v2293_v17 = vadd.f32 1e-05, %v695_v28  ;;  %v2900_v32 = vld [vmem:[#allocation45_spill] sm:$0xff] }
 0x13a   :  { %1229 = vst [vmem:[#allocation10 + $0x20] sm:$0xff] %v1154_v56  ;;  %v779_v38 = vmul.f32 0.5, %v778_v26  ;;  %v821_v27 = vmul.f32 %v2221_v21, %v820_v29  ;;  %v696_v3 = vmul.f32 0.0026041667, %v626_v44  ;;  %vm783_vm3 = vweird.f32 %v2258_v45 }
 0x13b   :  { %1230 = vst [vmem:[#allocation10 + $0x28] sm:$0xff] %v1155_v57  ;;  %v799_v25 = vmul.f32 0.5, %v798_v39  ;;  %v698_v14 = vmul.f32 0.0026041667, %v634_v59  ;;  %vm803_vm5 = vweird.f32 %v2267_v62  ;;  %1346 = vrsqrt.f32 %v2293_v17  ;;  %vm784_vm6 = vmor %vm782_vm2, %vm783_vm3 }
 0x13c   :  { %1240 = vst [vmem:[#allocation10 + $0x78] sm:$0xff] %v1165_v11  ;;  %v780_v18 = vsub.f32 1.5, %v779_v38  ;;  %v825_v24 = vsel %vm824_vm4, %v2221_v21, %v821_v27  ;;  %v2303_v49 = vadd.f32 1e-05, %v696_v3  ;;  %vm802_vm7 = vweird.f32 %v2195_v40 }
 0x13d   :  { %1241 = vst [vmem:[#allocation10 + $0x80] sm:$0xff] %v1166_v0  ;;  %v800_v33 = vsub.f32 1.5, %v799_v25  ;;  %v1010_v41 = vmul.f32 %v825_v24, %v1864_v19  ;;  %v1011_v50 = vmul.f32 %v825_v24, %v1867_v46  ;;  %v1012_v21 = vmul.f32 %v825_v24, %v1870_v7  ;;  %vm804_vm8 = vmor %vm802_vm7, %vm803_vm5  ;;  %v638_v25 = vpop.xlane.xlu2 %637 }
 0x13e   :  { %1242 = vst [vmem:[#allocation10 + $0x88] sm:$0xff] %v1167_v34  ;;  %v781_v12 = vmul.f32 %v2258_v45, %v780_v18  ;;  %v2308_v22 = vpop.eup %1344  ;;  %1348 = vrsqrt.f32 %v2303_v49  ;;  %v2317_v20 = vadd.f32 1e-05, %v698_v14  ;;  %v630_v18 = vpop.xlane.xlu0 %629  ;;  %vm812_vm10 = vweird.f32 %v2248_v58 }
 0x13f   :  { %v801_v19 = vmul.f32 %v2267_v62, %v800_v33  ;;  %v1092_v46 = vmul.f32 %v2173_v37, %v1010_v41  ;;  %v1093_v51 = vmul.f32 %v2176_v36, %v1011_v50  ;;  %v1094_v7 = vmul.f32 %v2178_v2, %v1012_v21 }
 0x140   :  { %v785_v47 = vsel %vm784_vm6, %v2258_v45, %v781_v12  ;;  %v807_v57 = vmul.f32 %v2308_v22, %v2248_v58  ;;  %vm813_vm9 = vweird.f32 %v2308_v22  ;;  %1350 = vrsqrt.f32 %v2317_v20 }
 0x141   :  { %v998_v4 = vmul.f32 %v785_v47, %v1847_v31  ;;  %v999_v5 = vmul.f32 %v785_v47, %v1855_v60  ;;  %v1000_v40 = vmul.f32 %v785_v47, %v1873_v43  ;;  %v805_v28 = vsel %vm804_vm8, %v2267_v62, %v801_v19  ;;  %v2334_v8 = vpop.eup %1346  ;;  %vm814_vm11 = vmor %vm812_vm10, %vm813_vm9 }
 0x142   :  { %v1174_v45 = vadd.f32 %v2180_v9, %v1092_v46  ;;  %v1175_v56 = vadd.f32 %v2182_v63, %v1093_v51  ;;  %v1004_v42 = vmul.f32 %v805_v28, %v1888_v61  ;;  %v1005_v26 = vmul.f32 %v805_v28, %v2900_v32 }
 0x143   :  { %v1080_v31 = vmul.f32 %v2173_v37, %v998_v4  ;;  %v1081_v60 = vmul.f32 %v2176_v36, %v999_v5  ;;  %v1082_v43 = vmul.f32 %v2178_v2, %v1000_v40  ;;  %v1006_v62 = vmul.f32 %v805_v28, %v1894_v6 }
 0x144   :  { %v1176_v52 = vadd.f32 %v2190_v30, %v1094_v7  ;;  %1249 = vst [vmem:[#allocation10 + $0xc0] sm:$0xff] %v1174_v45  ;;  %v808_v44 = vmul.f32 %v2308_v22, %v807_v57  ;;  %v2344_v11 = vpop.eup %1348  ;;  %v1086_v34 = vmul.f32 %v2173_v37, %v1004_v42  ;;  %v1087_v61 = vmul.f32 %v2176_v36, %v1005_v26  ;;  %v646_v45 = vpop.xlane.xlu1 %645 }
 0x145   :  { %v1162_v0 = vadd.f32 %v2180_v9, %v1080_v31  ;;  %v1163_v29 = vadd.f32 %v2182_v63, %v1081_v60  ;;  %v1164_v59 = vadd.f32 %v2190_v30, %v1082_v43  ;;  %1250 = vst [vmem:[#allocation10 + $0xc8] sm:$0xff] %v1175_v56  ;;  %v1088_v6 = vmul.f32 %v2178_v2, %v1006_v62 }
 0x146   :  { %1251 = vst [vmem:[#allocation10 + $0xd0] sm:$0xff] %v1176_v52  ;;  %v809_v38 = vmul.f32 0.5, %v808_v44  ;;  %v1168_v39 = vadd.f32 %v2180_v9, %v1086_v34  ;;  %v827_v27 = vmul.f32 %v2334_v8, %v2293_v17  ;;  %v837_v3 = vmul.f32 %v2344_v11, %v2303_v49  ;;  %v2902_v44 = vld [vmem:[#allocation47_spill] sm:$0xff] }
 0x147   :  { %1237 = vst [vmem:[#allocation10 + $0x60] sm:$0xff] %v1162_v0  ;;  %v1169_v14 = vadd.f32 %v2182_v63, %v1087_v61  ;;  %v1170_v24 = vadd.f32 %v2190_v30, %v1088_v6  ;;  %v697_v21 = vmul.f32 0.0026041667, %v630_v18  ;;  %v699_v47 = vmul.f32 0.0026041667, %v638_v25  ;;  %v2904_v61 = vld [vmem:[#allocation49_spill] sm:$0xff] }
 0x148   :  { %1238 = vst [vmem:[#allocation10 + $0x68] sm:$0xff] %v1163_v29  ;;  %v810_v12 = vsub.f32 1.5, %v809_v38  ;;  %v828_v33 = vmul.f32 %v2334_v8, %v827_v27  ;;  %v838_v41 = vmul.f32 %v2344_v11, %v837_v3  ;;  %vm832_vm12 = vweird.f32 %v2293_v17  ;;  %v2901_v17 = vld [vmem:[#allocation46_spill] sm:$0xff]  ;;  %v2903_v29 = vld [vmem:[#allocation48_spill] sm:$0xff]  ;;  %v2906_v27 = vld [vmem:[#allocation51_spill] sm:$0xff] }
 0x149   :  { %1239 = vst [vmem:[#allocation10 + $0x70] sm:$0xff] %v1164_v59  ;;  %vm833_vm13 = vweird.f32 %v2334_v8  ;;  %v2368_v4 = vadd.f32 1e-05, %v697_v21  ;;  %v2370_v5 = vadd.f32 1e-05, %v699_v47  ;;  %vm842_vm14 = vweird.f32 %v2303_v49  ;;  %v2905_v38 = vld [vmem:[#allocation50_spill] sm:$0xff] }
 0x14a   :  { %1243 = vst [vmem:[#allocation10 + $0x90] sm:$0xff] %v1168_v39  ;;  %v811_v50 = vmul.f32 %v2308_v22, %v810_v12  ;;  %v829_v19 = vmul.f32 0.5, %v828_v33  ;;  %v839_v46 = vmul.f32 0.5, %v838_v41  ;;  %vm843_vm15 = vweird.f32 %v2344_v11  ;;  %vm834_vm0 = vmor %vm832_vm12, %vm833_vm13 }
 0x14b   :  { %1244 = vst [vmem:[#allocation10 + $0x98] sm:$0xff] %v1169_v14  ;;  %1352 = vrsqrt.f32 %v2368_v4  ;;  %v701_v43 = vmul.f32 0.0026041667, %v646_v45  ;;  %vm844_vm1 = vmor %vm842_vm14, %vm843_vm15  ;;  %vm862_vm3 = vweird.f32 %v2317_v20  ;;  %vm852_vm5 = vweird.f32 %v2368_v4 }
 0x14c   :  { %1245 = vst [vmem:[#allocation10 + $0xa0] sm:$0xff] %v1170_v24  ;;  %v815_v51 = vsel %vm814_vm11, %v2308_v22, %v811_v50  ;;  %v830_v28 = vsub.f32 1.5, %v829_v19  ;;  %v840_v56 = vsub.f32 1.5, %v839_v46  ;;  %v2378_v22 = vpop.eup %1350  ;;  %1354 = vrsqrt.f32 %v2370_v5  ;;  %v642_v50 = vpop.xlane.xlu0 %641 }
 0x14d   :  { %v1007_v40 = vmul.f32 %v815_v51, %v1897_v1  ;;  %v1008_v58 = vmul.f32 %v815_v51, %v1900_v13  ;;  %v1009_v7 = vmul.f32 %v815_v51, %v1917_v55  ;;  %v857_v60 = vmul.f32 %v2378_v22, %v2317_v20 }
 0x14e   :  { %v831_v13 = vmul.f32 %v2334_v8, %v830_v28  ;;  %v841_v55 = vmul.f32 %v2344_v11, %v840_v56  ;;  %v2413_v24 = vadd.f32 1e-05, %v701_v43  ;;  %vm863_vm2 = vweird.f32 %v2378_v22 }
 0x14f   :  { %v1089_v57 = vmul.f32 %v2173_v37, %v1007_v40  ;;  %v1090_v31 = vmul.f32 %v2176_v36, %v1008_v58  ;;  %v1091_v1 = vmul.f32 %v2178_v2, %v1009_v7  ;;  %v858_v3 = vmul.f32 %v2378_v22, %v857_v60  ;;  %v650_v7 = vpop.xlane.xlu2 %649  ;;  %vm864_vm4 = vmor %vm862_vm3, %vm863_vm2 }
 0x150   :  { %v835_v62 = vsel %vm834_vm0, %v2334_v8, %v831_v13  ;;  %v845_v34 = vsel %vm844_vm1, %v2344_v11, %v841_v55  ;;  %1356 = vrsqrt.f32 %v2413_v24  ;;  %v700_v13 = vmul.f32 0.0026041667, %v642_v50  ;;  %v2912_v50 = vld [vmem:[#allocation25_spill] sm:$0xff] }
 0x151   :  { %v1171_v42 = vadd.f32 %v2180_v9, %v1089_v57  ;;  %v1172_v32 = vadd.f32 %v2182_v63, %v1090_v31  ;;  %v1173_v26 = vadd.f32 %v2190_v30, %v1091_v1  ;;  %v1013_v52 = vmul.f32 %v835_v62, %v2901_v17  ;;  %v2408_v18 = vpop.eup %1352  ;;  %v658_v57 = vpop.xlane.xlu1 %657  ;;  %v2908_v17 = vld [vmem:[#allocation18_spill] sm:$0xff] }
 0x152   :  { %v1014_v0 = vmul.f32 %v835_v62, %v2902_v44  ;;  %v1015_v59 = vmul.f32 %v835_v62, %v2903_v29  ;;  %v1016_v6 = vmul.f32 %v845_v34, %v2904_v61  ;;  %v1017_v39 = vmul.f32 %v845_v34, %v2905_v38  ;;  %v2418_v21 = vpop.eup %1354  ;;  %v2909_v44 = vld [vmem:[#allocation24_spill] sm:$0xff] }
 0x153   :  { %1246 = vst [vmem:[#allocation10 + $0xa8] sm:$0xff] %v1171_v42  ;;  %v1018_v8 = vmul.f32 %v845_v34, %v2906_v27  ;;  %v1095_v49 = vmul.f32 %v2173_v37, %v1013_v52  ;;  %v859_v41 = vmul.f32 0.5, %v858_v3  ;;  %v847_v51 = vmul.f32 %v2408_v18, %v2368_v4  ;;  %v2911_v4 = vld [vmem:[#allocation22_spill] sm:$0xff] }
 0x154   :  { %1247 = vst [vmem:[#allocation10 + $0xb0] sm:$0xff] %v1172_v32  ;;  %v1096_v25 = vmul.f32 %v2176_v36, %v1014_v0  ;;  %v1097_v14 = vmul.f32 %v2178_v2, %v1015_v59  ;;  %v1098_v11 = vmul.f32 %v2173_v37, %v1016_v6  ;;  %v1099_v12 = vmul.f32 %v2176_v36, %v1017_v39  ;;  %v654_v3 = vpop.xlane.xlu0 %653 }
 0x155   :  { %1248 = vst [vmem:[#allocation10 + $0xb8] sm:$0xff] %v1173_v26  ;;  %v1100_v33 = vmul.f32 %v2178_v2, %v1018_v8  ;;  %v1177_v47 = vadd.f32 %v2180_v9, %v1095_v49  ;;  %v860_v58 = vsub.f32 1.5, %v859_v41  ;;  %v848_v45 = vmul.f32 %v2408_v18, %v847_v51  ;;  %v2907_v26 = vld [vmem:[#allocation52_spill] sm:$0xff] }
 0x156   :  { %v1178_v19 = vadd.f32 %v2182_v63, %v1096_v25  ;;  %v1179_v46 = vadd.f32 %v2190_v30, %v1097_v14  ;;  %v1180_v40 = vadd.f32 %v2180_v9, %v1098_v11  ;;  %v1181_v28 = vadd.f32 %v2182_v63, %v1099_v12  ;;  %v2452_v39 = vpop.eup %1356  ;;  %v2910_v12 = vld [vmem:[#allocation21_spill] sm:$0xff] }
 0x157   :  { %1252 = vst [vmem:[#allocation10 + $0xd8] sm:$0xff] %v1177_v47  ;;  %v867_v56 = vmul.f32 %v2418_v21, %v2370_v5  ;;  %v1182_v31 = vadd.f32 %v2190_v30, %v1100_v33  ;;  %v861_v1 = vmul.f32 %v2378_v22, %v860_v58  ;;  %v849_v55 = vmul.f32 0.5, %v848_v45 }
 0x158   :  { %1253 = vst [vmem:[#allocation10 + $0xe0] sm:$0xff] %v1178_v19  ;;  %v702_v60 = vmul.f32 0.0026041667, %v650_v7  ;;  %vm853_vm6 = vweird.f32 %v2408_v18  ;;  %v2439_v42 = vadd.f32 1e-05, %v700_v13  ;;  %vm872_vm7 = vweird.f32 %v2370_v5 }
 0x159   :  { %1254 = vst [vmem:[#allocation10 + $0xe8] sm:$0xff] %v1179_v46  ;;  %v868_v20 = vmul.f32 %v2418_v21, %v867_v56  ;;  %v865_v43 = vsel %vm864_vm4, %v2378_v22, %v861_v1  ;;  %v704_v32 = vmul.f32 0.0026041667, %v658_v57  ;;  %v850_v29 = vsub.f32 1.5, %v849_v55  ;;  %vm854_vm8 = vmor %vm852_vm5, %vm853_vm6  ;;  %v2914_v56 = vld [vmem:[#allocation20_spill] sm:$0xff] }
 0x15a   :  { %1255 = vst [vmem:[#allocation10 + $0xf0] sm:$0xff] %v1180_v40  ;;  %v1022_v62 = vmul.f32 %v865_v43, %v2907_v26  ;;  %v1023_v52 = vmul.f32 %v865_v43, %v2908_v17  ;;  %v1024_v0 = vmul.f32 %v865_v43, %v2909_v44  ;;  %1358 = vrsqrt.f32 %v2439_v42 }
 0x15b   :  { %1256 = vst [vmem:[#allocation10 + $0xf8] sm:$0xff] %v1181_v28  ;;  %v869_v59 = vmul.f32 0.5, %v868_v20  ;;  %v2446_v22 = vadd.f32 1e-05, %v702_v60  ;;  %v851_v38 = vmul.f32 %v2408_v18, %v850_v29  ;;  %vm873_vm9 = vweird.f32 %v2418_v21  ;;  %v2913_v28 = vld [vmem:[#allocation19_spill] sm:$0xff] }
 0x15c   :  { %1257 = vst [vmem:[#allocation10 + $0x100] sm:$0xff] %v1182_v31  ;;  %v1104_v34 = vmul.f32 %v2173_v37, %v1022_v62  ;;  %v1105_v61 = vmul.f32 %v2176_v36, %v1023_v52  ;;  %v1106_v6 = vmul.f32 %v2178_v2, %v1024_v0  ;;  %v2460_v8 = vadd.f32 1e-05, %v704_v32  ;;  %vm874_vm10 = vmor %vm872_vm7, %vm873_vm9  ;;  %v2915_v31 = vld [vmem:[#allocation23_spill] sm:$0xff]  ;;  %v662_v0 = vpop.xlane.xlu2 %661 }
 0x15d   :  { %v870_v27 = vsub.f32 1.5, %v869_v59  ;;  %1360 = vrsqrt.f32 %v2446_v22  ;;  %v855_v11 = vsel %vm854_vm8, %v2408_v18, %v851_v38  ;;  %v887_v46 = vmul.f32 %v2452_v39, %v2413_v24 }
 0x15e   :  { %v1186_v49 = vadd.f32 %v2180_v9, %v1104_v34  ;;  %v1187_v25 = vadd.f32 %v2182_v63, %v1105_v61  ;;  %v1188_v14 = vadd.f32 %v2190_v30, %v1106_v6  ;;  %v1019_v33 = vmul.f32 %v855_v11, %v2910_v12 }
 0x15f   :  { %v1020_v41 = vmul.f32 %v855_v11, %v2911_v4  ;;  %v1021_v47 = vmul.f32 %v855_v11, %v2912_v50  ;;  %v871_v19 = vmul.f32 %v2418_v21, %v870_v27  ;;  %vm892_vm11 = vweird.f32 %v2413_v24  ;;  %v670_v4 = vpop.xlane.xlu1 %669  ;;  %v2916_v24 = vld [vmem:[#allocation28_spill] sm:$0xff] }
 0x160   :  { %1261 = vst [vmem:[#allocation10 + $0x120] sm:$0xff] %v1186_v49  ;;  %1362 = vrsqrt.f32 %v2460_v8  ;;  %v703_v18 = vmul.f32 0.0026041667, %v654_v3  ;;  %v2476_v51 = vpop.eup %1358  ;;  %v1101_v40 = vmul.f32 %v2173_v37, %v1019_v33  ;;  %v888_v13 = vmul.f32 %v2452_v39, %v887_v46 }
 0x161   :  { %1262 = vst [vmem:[#allocation10 + $0x128] sm:$0xff] %v1187_v25  ;;  %v1102_v58 = vmul.f32 %v2176_v36, %v1020_v41  ;;  %v1103_v7 = vmul.f32 %v2178_v2, %v1021_v47  ;;  %v875_v5 = vsel %vm874_vm10, %v2418_v21, %v871_v19  ;;  %v877_v21 = vmul.f32 %v2476_v51, %v2439_v42  ;;  %v2917_v19 = vld [vmem:[#allocation29_spill] sm:$0xff] }
 0x162   :  { %1263 = vst [vmem:[#allocation10 + $0x130] sm:$0xff] %v1188_v14  ;;  %v1025_v45 = vmul.f32 %v875_v5, %v2913_v28  ;;  %v1026_v57 = vmul.f32 %v875_v5, %v2914_v56  ;;  %v1027_v1 = vmul.f32 %v875_v5, %v2915_v31  ;;  %v1183_v20 = vadd.f32 %v2180_v9, %v1101_v40  ;;  %v2919_v31 = vld [vmem:[#allocation54_spill] sm:$0xff] }
 0x163   :  { %v2486_v55 = vpop.eup %1360  ;;  %v1184_v60 = vadd.f32 %v2182_v63, %v1102_v58  ;;  %v1185_v43 = vadd.f32 %v2190_v30, %v1103_v7  ;;  %v889_v17 = vmul.f32 0.5, %v888_v13  ;;  %vm893_vm12 = vweird.f32 %v2452_v39  ;;  %v2920_v13 = vld [vmem:[#allocation30_spill] sm:$0xff] }
 0x164   :  { %v1107_v32 = vmul.f32 %v2173_v37, %v1025_v45  ;;  %v1108_v26 = vmul.f32 %v2176_v36, %v1026_v57  ;;  %v1109_v62 = vmul.f32 %v2178_v2, %v1027_v1  ;;  %1258 = vst [vmem:[#allocation10 + $0x108] sm:$0xff] %v1183_v20  ;;  %v878_v52 = vmul.f32 %v2476_v51, %v877_v21  ;;  %vm894_vm0 = vmor %vm892_vm11, %vm893_vm12 }
 0x165   :  { %vm882_vm13 = vweird.f32 %v2439_v42  ;;  %v897_v44 = vmul.f32 %v2486_v55, %v2446_v22  ;;  %1259 = vst [vmem:[#allocation10 + $0x110] sm:$0xff] %v1184_v60  ;;  %v890_v6 = vsub.f32 1.5, %v889_v17  ;;  %vm902_vm14 = vweird.f32 %v2446_v22 }
 0x166   :  { %v2501_v29 = vpop.eup %1362  ;;  %v1189_v59 = vadd.f32 %v2180_v9, %v1107_v32  ;;  %v1190_v34 = vadd.f32 %v2182_v63, %v1108_v26  ;;  %v1191_v61 = vadd.f32 %v2190_v30, %v1109_v62  ;;  %1260 = vst [vmem:[#allocation10 + $0x118] sm:$0xff] %v1185_v43  ;;  %v879_v38 = vmul.f32 0.5, %v878_v52  ;;  %v666_v43 = vpop.xlane.xlu0 %665 }
 0x167   :  { %v898_v27 = vmul.f32 %v2486_v55, %v897_v44  ;;  %v917_v3 = vmul.f32 %v2501_v29, %v2460_v8  ;;  %v891_v49 = vmul.f32 %v2452_v39, %v890_v6  ;;  %vm883_vm15 = vweird.f32 %v2476_v51 }
 0x168   :  { %1264 = vst [vmem:[#allocation10 + $0x138] sm:$0xff] %v1189_v59  ;;  %v2512_v25 = vadd.f32 1e-05, %v703_v18  ;;  %v705_v14 = vmul.f32 0.0026041667, %v662_v0  ;;  %v880_v11 = vsub.f32 1.5, %v879_v38  ;;  %vm903_vm1 = vweird.f32 %v2486_v55  ;;  %vm884_vm4 = vmor %vm882_vm13, %vm883_vm15 }
 0x169   :  { %1265 = vst [vmem:[#allocation10 + $0x140] sm:$0xff] %v1190_v34  ;;  %v899_v12 = vmul.f32 0.5, %v898_v27  ;;  %v918_v33 = vmul.f32 %v2501_v29, %v917_v3  ;;  %vm922_vm2 = vweird.f32 %v2460_v8  ;;  %v895_v41 = vsel %vm894_vm0, %v2452_v39, %v891_v49  ;;  %v2918_v18 = vld [vmem:[#allocation53_spill] sm:$0xff]  ;;  %vm904_vm5 = vmor %vm902_vm14, %vm903_vm1  ;;  %v2921_v59 = vld [vmem:[#allocation32_spill] sm:$0xff] }
 0x16a   :  { %1266 = vst [vmem:[#allocation10 + $0x148] sm:$0xff] %v1191_v61  ;;  %vm923_vm3 = vweird.f32 %v2501_v29  ;;  %1364 = vrsqrt.f32 %v2512_v25  ;;  %v2524_v50 = vadd.f32 1e-05, %v705_v14  ;;  %v1031_v47 = vmul.f32 %v895_v41, %v2916_v24 }
 0x16b   :  { %v1032_v46 = vmul.f32 %v895_v41, %v2917_v19  ;;  %v1033_v40 = vmul.f32 %v895_v41, %v2918_v18  ;;  %v881_v58 = vmul.f32 %v2476_v51, %v880_v11  ;;  %v900_v39 = vsub.f32 1.5, %v899_v12  ;;  %vm924_vm6 = vmor %vm922_vm2, %vm923_vm3  ;;  %v2922_v11 = vld [vmem:[#allocation26_spill] sm:$0xff] }
 0x16c   :  { %v919_v7 = vmul.f32 0.5, %v918_v33  ;;  %1366 = vrsqrt.f32 %v2524_v50  ;;  %v707_v5 = vmul.f32 0.0026041667, %v670_v4  ;;  %v1113_v28 = vmul.f32 %v2173_v37, %v1031_v47  ;;  %v2923_v33 = vld [vmem:[#allocation27_spill] sm:$0xff] }
 0x16d   :  { %v1114_v45 = vmul.f32 %v2176_v36, %v1032_v46  ;;  %v1115_v56 = vmul.f32 %v2178_v2, %v1033_v40  ;;  %v885_v57 = vsel %vm884_vm4, %v2476_v51, %v881_v58  ;;  %v901_v60 = vmul.f32 %v2486_v55, %v900_v39 }
 0x16e   :  { %v1028_v1 = vmul.f32 %v885_v57, %v2919_v31  ;;  %v1029_v20 = vmul.f32 %v885_v57, %v2920_v13  ;;  %v1030_v42 = vmul.f32 %v885_v57, %v2014_v48  ;;  %v1195_v21 = vadd.f32 %v2180_v9, %v1113_v28  ;;  %v685_v28 = vpop.xlane.xlu1 %684 }
 0x16f   :  { %v1196_v32 = vadd.f32 %v2182_v63, %v1114_v45  ;;  %v1197_v26 = vadd.f32 %v2190_v30, %v1115_v56  ;;  %v920_v51 = vsub.f32 1.5, %v919_v7  ;;  %v905_v44 = vsel %vm904_vm5, %v2486_v55, %v901_v60  ;;  %v674_v7 = vpop.xlane.xlu2 %673 }
 0x170   :  { %v2550_v62 = vpop.eup %1364  ;;  %v1110_v17 = vmul.f32 %v2173_v37, %v1028_v1  ;;  %v1111_v48 = vmul.f32 %v2176_v36, %v1029_v20  ;;  %v1112_v52 = vmul.f32 %v2178_v2, %v1030_v42  ;;  %1270 = vst [vmem:[#allocation10 + $0x168] sm:$0xff] %v1195_v21  ;;  %v1034_v0 = vmul.f32 %v905_v44, %v2023_v15  ;;  %v678_v1 = vpop.xlane.xlu0 %677 }
 0x171   :  { %v1035_v34 = vmul.f32 %v905_v44, %v2921_v59  ;;  %v1036_v61 = vmul.f32 %v905_v44, %v2033_v16  ;;  %v921_v22 = vmul.f32 %v2501_v29, %v920_v51  ;;  %1271 = vst [vmem:[#allocation10 + $0x170] sm:$0xff] %v1196_v32  ;;  %v907_v15 = vmul.f32 %v2550_v62, %v2512_v25 }
 0x172   :  { %v2560_v6 = vpop.eup %1366  ;;  %v1192_v38 = vadd.f32 %v2180_v9, %v1110_v17  ;;  %v1193_v27 = vadd.f32 %v2182_v63, %v1111_v48  ;;  %v1194_v3 = vadd.f32 %v2190_v30, %v1112_v52  ;;  %1272 = vst [vmem:[#allocation10 + $0x178] sm:$0xff] %v1197_v26  ;;  %v1116_v16 = vmul.f32 %v2173_v37, %v1034_v0  ;;  %v2925_v48 = vld [vmem:[#allocation35_spill] sm:$0xff] }
 0x173   :  { %v1117_v55 = vmul.f32 %v2176_v36, %v1035_v34  ;;  %v1118_v49 = vmul.f32 %v2178_v2, %v1036_v61  ;;  %v925_v14 = vsel %vm924_vm6, %v2501_v29, %v921_v22  ;;  %v908_v41 = vmul.f32 %v2550_v62, %v907_v15 }
 0x174   :  { %1267 = vst [vmem:[#allocation10 + $0x150] sm:$0xff] %v1192_v38  ;;  %v1040_v12 = vmul.f32 %v925_v14, %v2922_v11  ;;  %v1041_v4 = vmul.f32 %v925_v14, %v2923_v33  ;;  %v1042_v8 = vmul.f32 %v925_v14, %v2042_v54  ;;  %v1198_v24 = vadd.f32 %v2180_v9, %v1116_v16 }
 0x175   :  { %1268 = vst [vmem:[#allocation10 + $0x158] sm:$0xff] %v1193_v27  ;;  %v1199_v47 = vadd.f32 %v2182_v63, %v1117_v55  ;;  %v1200_v19 = vadd.f32 %v2190_v30, %v1118_v49  ;;  %v909_v40 = vmul.f32 0.5, %v908_v41  ;;  %vm913_vm7 = vweird.f32 %v2550_v62 }
 0x176   :  { %1269 = vst [vmem:[#allocation10 + $0x160] sm:$0xff] %v1194_v3  ;;  %v1122_v46 = vmul.f32 %v2173_v37, %v1040_v12  ;;  %v1123_v29 = vmul.f32 %v2176_v36, %v1041_v4  ;;  %v1124_v18 = vmul.f32 %v2178_v2, %v1042_v8  ;;  %v927_v54 = vmul.f32 %v2560_v6, %v2524_v50 }
 0x177   :  { %1273 = vst [vmem:[#allocation10 + $0x180] sm:$0xff] %v1198_v24  ;;  %v2588_v58 = vadd.f32 1e-05, %v707_v5  ;;  %v706_v39 = vmul.f32 0.0026041667, %v666_v43  ;;  %v910_v31 = vsub.f32 1.5, %v909_v40  ;;  %vm912_vm8 = vweird.f32 %v2512_v25 }
 0x178   :  { %1274 = vst [vmem:[#allocation10 + $0x188] sm:$0xff] %v1199_v47  ;;  %v1204_v45 = vadd.f32 %v2180_v9, %v1122_v46  ;;  %v1205_v56 = vadd.f32 %v2182_v63, %v1123_v29  ;;  %v1206_v57 = vadd.f32 %v2190_v30, %v1124_v18  ;;  %v928_v13 = vmul.f32 %v2560_v6, %v927_v54  ;;  %vm914_vm9 = vmor %vm912_vm8, %vm913_vm7  ;;  %v2924_v25 = vld [vmem:[#allocation31_spill] sm:$0xff] }
 0x179   :  { %1275 = vst [vmem:[#allocation10 + $0x190] sm:$0xff] %v1200_v19  ;;  %1368 = vrsqrt.f32 %v2588_v58  ;;  %v2595_v20 = vadd.f32 1e-05, %v706_v39  ;;  %v911_v5 = vmul.f32 %v2550_v62, %v910_v31  ;;  %v708_v42 = vmul.f32 0.0026041667, %v674_v7 }
 0x17a   :  { %1279 = vst [vmem:[#allocation10 + $0x1b0] sm:$0xff] %v1204_v45  ;;  %v710_v60 = vmul.f32 0.0026041667, %v685_v28  ;;  %v929_v43 = vmul.f32 0.5, %v928_v13  ;;  %v709_v21 = vmul.f32 0.0026041667, %v678_v1  ;;  %vm933_vm10 = vweird.f32 %v2560_v6 }
 0x17b   :  { %1280 = vst [vmem:[#allocation10 + $0x1b8] sm:$0xff] %v1205_v56  ;;  %1370 = vrsqrt.f32 %v2595_v20  ;;  %v915_v32 = vsel %vm914_vm9, %v2550_v62, %v911_v5  ;;  %v2604_v26 = vadd.f32 1e-05, %v708_v42  ;;  %vm932_vm11 = vweird.f32 %v2524_v50  ;;  %v2927_v1 = vld [vmem:[#allocation33_spill] sm:$0xff]  ;;  %v2928_v5 = vld [vmem:[#allocation34_spill] sm:$0xff] }
 0x17c   :  { %1281 = vst [vmem:[#allocation10 + $0x1c0] sm:$0xff] %v1206_v57  ;;  %v2606_v51 = vadd.f32 1e-05, %v710_v60  ;;  %v1037_v17 = vmul.f32 %v915_v32, %v2924_v25  ;;  %v1038_v52 = vmul.f32 %v915_v32, %v2925_v48  ;;  %v1039_v44 = vmul.f32 %v915_v32, %v2058_v53  ;;  %vm934_vm12 = vmor %vm932_vm11, %vm933_vm10  ;;  %v2926_v57 = vld [vmem:[#allocation38_spill] sm:$0xff] }
 0x17d   :  { %v930_v0 = vsub.f32 1.5, %v929_v43  ;;  %1372 = vrsqrt.f32 %v2604_v26  ;;  %v2613_v59 = vadd.f32 1e-05, %v709_v21  ;;  %vm952_vm14 = vweird.f32 %v2588_v58 }
 0x17e   :  { %v1119_v34 = vmul.f32 %v2173_v37, %v1037_v17  ;;  %v1120_v61 = vmul.f32 %v2176_v36, %v1038_v52  ;;  %v1121_v22 = vmul.f32 %v2178_v2, %v1039_v44  ;;  %1374 = vrsqrt.f32 %v2606_v51  ;;  %v2929_v44 = vld [vmem:[#allocation15_spill] sm:$0xff] }
 0x17f   :  { %v1369_v62 = vpop.eup %1368  ;;  %v931_v38 = vmul.f32 %v2560_v6, %v930_v0  ;;  %1376 = vrsqrt.f32 %v2613_v59  ;;  %vm942_vm15 = vweird.f32 %v2595_v20  ;;  %vm962_vm0 = vweird.f32 %v2604_v26 }
 0x180   :  { %v947_v53 = vmul.f32 %v1369_v62, %v2588_v58  ;;  %v1201_v27 = vadd.f32 %v2180_v9, %v1119_v34  ;;  %v1202_v3 = vadd.f32 %v2182_v63, %v1120_v61  ;;  %v1203_v15 = vadd.f32 %v2190_v30, %v1121_v22  ;;  %v2931_v61 = vld [vmem:[#allocation39_spill] sm:$0xff] }
 0x181   :  { %v1371_v50 = vpop.eup %1370  ;;  %v935_v16 = vsel %vm934_vm12, %v2560_v6, %v931_v38  ;;  %vm953_vm13 = vweird.f32 %v1369_v62  ;;  %vm982_vm3 = vweird.f32 %v2606_v51  ;;  %vm972_vm10 = vweird.f32 %v2613_v59 }
 0x182   :  { %v1043_v55 = vmul.f32 %v935_v16, %v2061_v35  ;;  %v1044_v49 = vmul.f32 %v935_v16, %v2066_v10  ;;  %v1045_v14 = vmul.f32 %v935_v16, %v2083_v23  ;;  %v948_v11 = vmul.f32 %v1369_v62, %v947_v53  ;;  %1276 = vst [vmem:[#allocation10 + $0x198] sm:$0xff] %v1201_v27  ;;  %vm954_vm1 = vmor %vm952_vm14, %vm953_vm13 }
 0x183   :  { %v937_v12 = vmul.f32 %v1371_v50, %v2595_v20  ;;  %v1373_v33 = vpop.eup %1372  ;;  %1277 = vst [vmem:[#allocation10 + $0x1a0] sm:$0xff] %v1202_v3  ;;  %vm943_vm2 = vweird.f32 %v1371_v50 }
 0x184   :  { %v1125_v4 = vmul.f32 %v2173_v37, %v1043_v55  ;;  %v1126_v8 = vmul.f32 %v2176_v36, %v1044_v49  ;;  %v1127_v6 = vmul.f32 %v2178_v2, %v1045_v14  ;;  %v949_v41 = vmul.f32 0.5, %v948_v11  ;;  %1278 = vst [vmem:[#allocation10 + $0x1a8] sm:$0xff] %v1203_v15  ;;  %v2636_v10 = vpop.eup %1374  ;;  %vm944_vm6 = vmor %vm942_vm15, %vm943_vm2  ;;  %v2932_v49 = vld [vmem:[#allocation55_spill] sm:$0xff]  ;;  %v2933_v11 = vld [vmem:[#allocation56_spill] sm:$0xff] }
 0x185   :  { %v938_v35 = vmul.f32 %v1371_v50, %v937_v12  ;;  %v957_v23 = vmul.f32 %v1373_v33, %v2604_v26  ;;  %v977_v40 = vmul.f32 %v2636_v10, %v2606_v51  ;;  %v2646_v39 = vpop.eup %1376  ;;  %vm963_vm4 = vweird.f32 %v1373_v33 }
 0x186   :  { %v1207_v24 = vadd.f32 %v2180_v9, %v1125_v4  ;;  %v1208_v47 = vadd.f32 %v2182_v63, %v1126_v8  ;;  %v1209_v19 = vadd.f32 %v2190_v30, %v1127_v6  ;;  %v950_v46 = vsub.f32 1.5, %v949_v41  ;;  %vm964_vm8 = vmor %vm962_vm0, %vm963_vm4  ;;  %v2934_v4 = vld [vmem:[#allocation57_spill] sm:$0xff] }
 0x187   :  { %v939_v29 = vmul.f32 0.5, %v938_v35  ;;  %v958_v18 = vmul.f32 %v1373_v33, %v957_v23  ;;  %v978_v45 = vmul.f32 %v2636_v10, %v977_v40  ;;  %vm983_vm5 = vweird.f32 %v2636_v10 }
 0x188   :  { %1282 = vst [vmem:[#allocation10 + $0x1c8] sm:$0xff] %v1207_v24  ;;  %v951_v54 = vmul.f32 %v1369_v62, %v950_v46  ;;  %v967_v58 = vmul.f32 %v2646_v39, %v2613_v59  ;;  %vm973_vm7 = vweird.f32 %v2646_v39  ;;  %vm984_vm9 = vmor %vm982_vm3, %vm983_vm5  ;;  %v2935_v46 = vld [vmem:[#allocation36_spill] sm:$0xff] }
 0x189   :  { %1283 = vst [vmem:[#allocation10 + $0x1d0] sm:$0xff] %v1208_v47  ;;  %v940_v7 = vsub.f32 1.5, %v939_v29  ;;  %v959_v28 = vmul.f32 0.5, %v958_v18  ;;  %v979_v21 = vmul.f32 0.5, %v978_v45  ;;  %v2936_v18 = vld [vmem:[#allocation37_spill] sm:$0xff]  ;;  %vm974_vm11 = vmor %vm972_vm10, %vm973_vm7 }
 0x18a   :  { %1284 = vst [vmem:[#allocation10 + $0x1d8] sm:$0xff] %v1209_v19  ;;  %v955_v56 = vsel %vm954_vm1, %v1369_v62, %v951_v54  ;;  %v968_v32 = vmul.f32 %v2646_v39, %v967_v58  ;;  %v2930_v62 = vld [vmem:[#allocation16_spill] sm:$0xff]  ;;  %v2937_v54 = vld [vmem:[#allocation17_spill] sm:$0xff] }
 0x18b   :  { %v1049_v31 = vmul.f32 %v955_v56, %v2926_v57  ;;  %v1050_v13 = vmul.f32 %v955_v56, %v2927_v1  ;;  %v1051_v42 = vmul.f32 %v955_v56, %v2928_v5  ;;  %v941_v60 = vmul.f32 %v1371_v50, %v940_v7 }
 0x18c   :  { %v960_v43 = vsub.f32 1.5, %v959_v28  ;;  %v980_v3 = vsub.f32 1.5, %v979_v21 }
 0x18d   :  { %v1131_v25 = vmul.f32 %v2173_v37, %v1049_v31  ;;  %v1132_v17 = vmul.f32 %v2176_v36, %v1050_v13  ;;  %v1133_v48 = vmul.f32 %v2178_v2, %v1051_v42  ;;  %v945_v52 = vsel %vm944_vm6, %v1371_v50, %v941_v60  ;;  %v2938_v42 = vld [vmem:[#allocation58_spill] sm:$0xff] }
 0x18e   :  { %v1046_v0 = vmul.f32 %v945_v52, %v2929_v44  ;;  %v1047_v34 = vmul.f32 %v945_v52, %v2930_v62  ;;  %v1048_v20 = vmul.f32 %v945_v52, %v2931_v61  ;;  %v961_v22 = vmul.f32 %v1373_v33, %v960_v43  ;;  %v2939_v43 = vld [vmem:[#allocation59_spill] sm:$0xff] }
 0x18f   :  { %v1213_v38 = vadd.f32 %v2180_v9, %v1131_v25  ;;  %v1214_v53 = vadd.f32 %v2182_v63, %v1132_v17  ;;  %v1215_v27 = vadd.f32 %v2190_v30, %v1133_v48  ;;  %v981_v6 = vmul.f32 %v2636_v10, %v980_v3 }
 0x190   :  { %v1128_v50 = vmul.f32 %v2173_v37, %v1046_v0  ;;  %v1129_v15 = vmul.f32 %v2176_v36, %v1047_v34  ;;  %v1130_v16 = vmul.f32 %v2178_v2, %v1048_v20  ;;  %v965_v55 = vsel %vm964_vm8, %v1373_v33, %v961_v22 }
 0x191   :  { %1288 = vst [vmem:[#allocation10 + $0x1f8] sm:$0xff] %v1213_v38  ;;  %v1052_v14 = vmul.f32 %v965_v55, %v2932_v49  ;;  %v1053_v12 = vmul.f32 %v965_v55, %v2933_v11  ;;  %v1054_v8 = vmul.f32 %v965_v55, %v2934_v4  ;;  %v969_v33 = vmul.f32 0.5, %v968_v32  ;;  %v2940_v32 = vld [vmem:[#allocation60_spill] sm:$0xff] }
 0x192   :  { %1289 = vst [vmem:[#allocation10 + $0x200] sm:$0xff] %v1214_v53  ;;  %v1210_v26 = vadd.f32 %v2180_v9, %v1128_v50  ;;  %v1211_v41 = vadd.f32 %v2182_v63, %v1129_v15  ;;  %v1212_v35 = vadd.f32 %v2190_v30, %v1130_v16  ;;  %v985_v19 = vsel %vm984_vm9, %v2636_v10, %v981_v6 }
 0x193   :  { %1290 = vst [vmem:[#allocation10 + $0x208] sm:$0xff] %v1215_v27  ;;  %v1134_v23 = vmul.f32 %v2173_v37, %v1052_v14  ;;  %v1135_v24 = vmul.f32 %v2176_v36, %v1053_v12  ;;  %v1136_v47 = vmul.f32 %v2178_v2, %v1054_v8  ;;  %v1058_v29 = vmul.f32 %v985_v19, %v2935_v46 }
 0x194   :  { %1285 = vst [vmem:[#allocation10 + $0x1e0] sm:$0xff] %v1210_v26  ;;  %v1059_v40 = vmul.f32 %v985_v19, %v2936_v18  ;;  %v1060_v7 = vmul.f32 %v985_v19, %v2937_v54  ;;  %v970_v28 = vsub.f32 1.5, %v969_v33 }
 0x195   :  { %1286 = vst [vmem:[#allocation10 + $0x1e8] sm:$0xff] %v1211_v41  ;;  %v1216_v51 = vadd.f32 %v2180_v9, %v1134_v23  ;;  %v1217_v45 = vadd.f32 %v2182_v63, %v1135_v24  ;;  %v1218_v56 = vadd.f32 %v2190_v30, %v1136_v47  ;;  %v1140_v10 = vmul.f32 %v2173_v37, %v1058_v29 }
 0x196   :  { %1287 = vst [vmem:[#allocation10 + $0x1f0] sm:$0xff] %v1212_v35  ;;  %v1141_v58 = vmul.f32 %v2176_v36, %v1059_v40  ;;  %v1142_v57 = vmul.f32 %v2178_v2, %v1060_v7  ;;  %v971_v31 = vmul.f32 %v2646_v39, %v970_v28 }
 0x197   :  { %1291 = vst [vmem:[#allocation10 + $0x210] sm:$0xff] %v1216_v51  ;;  %v1222_v1 = vadd.f32 %v2180_v9, %v1140_v10 }
 0x198   :  { %1292 = vst [vmem:[#allocation10 + $0x218] sm:$0xff] %v1217_v45  ;;  %v1223_v13 = vadd.f32 %v2182_v63, %v1141_v58  ;;  %v1224_v59 = vadd.f32 %v2190_v30, %v1142_v57  ;;  %v975_v5 = vsel %vm974_vm11, %v2646_v39, %v971_v31 }
 0x199   :  { %1293 = vst [vmem:[#allocation10 + $0x220] sm:$0xff] %v1218_v56  ;;  %v1055_v60 = vmul.f32 %v975_v5, %v2938_v42  ;;  %v1056_v21 = vmul.f32 %v975_v5, %v2939_v43  ;;  %v1057_v25 = vmul.f32 %v975_v5, %v2940_v32 }
 0x19a   :  { %1297 = vst [vmem:[#allocation10 + $0x240] sm:$0xf] %v1222_v1 }
 0x19b   :  { %1298 = vst [vmem:[#allocation10 + $0x248] sm:$0xf] %v1223_v13  ;;  %v1137_v17 = vmul.f32 %v2173_v37, %v1055_v60  ;;  %v1138_v48 = vmul.f32 %v2176_v36, %v1056_v21  ;;  %v1139_v52 = vmul.f32 %v2178_v2, %v1057_v25 }
 0x19c   :  { %1299 = vst [vmem:[#allocation10 + $0x250] sm:$0xf] %v1224_v59 }
 0x19d   :  { %v1219_v39 = vadd.f32 %v2180_v9, %v1137_v17  ;;  %v1220_v44 = vadd.f32 %v2182_v63, %v1138_v48  ;;  %v1221_v0 = vadd.f32 %v2190_v30, %v1139_v52 }
 0x19f   :  { %1294 = vst [vmem:[#allocation10 + $0x228] sm:$0xff] %v1219_v39 }
 0x1a0   :  { %1295 = vst [vmem:[#allocation10 + $0x230] sm:$0xff] %v1220_v44 }
 0x1a1   :  { %1296 = vst [vmem:[#allocation10 + $0x238] sm:$0xff] %v1221_v0 }
 0x1a2   :  { %1312 = dma.vmem_to_hbm [thread:$0]  %s1305_s3, 9600, %s1307_s11, [#allocation4], %s1507_s23, %s1507_s23, %s1508_s24  }
 0x1a3   :  { %1504 = dma.done.wait [#allocation4], 9600  }
 0x1a4   :  { %1505 = vsyncadd [#allocation4], 4294957696 }
 0x1a5   :  { %1317 = vsyncpa [#allocation3], 1 }
 0x1a6   :  { %1318 = vsyncpa [#allocation6], 1 }
 0x1a7   :  { %1319 = vsyncpa [#allocation9], 1 }
 0x1a8   :  { %1320 = vsyncpa [#allocation4], 1 }

</bundles_post_ra>
